<compile_context>
chip_gen: v5e
topology: v5e:2x2
jax: 0.10.0
libtpu: 0.0.40
codegen_flags: <defaults>
</compile_context>

<pallas_src>
import jax
import jax.numpy as jnp
from jax.experimental import pallas as pl
from jax.experimental.pallas import tpu as pltpu


# ----------------------------------------------------------------------------
# Fused Pallas kernel: 4 LSTM layers + FC head, single invocation (no grid).
# ----------------------------------------------------------------------------
def fused_lstm_kernel(x_ref, wih0_ref, wihr_ref, whh_ref, b_ref,
                      ga_ref, gb_ref, wfc_ref, bfc_ref, out_ref):
    """All refs are whole-array VMEM blocks.

      x_ref   : (T, B, I)      time-major input sequence
      wih0_ref: (I, 4H)        layer-0 input->hidden weights (transposed, gate-scaled)
      wihr_ref: (L-1, H, 4H)   layers 1..L-1 input->hidden weights (transposed, scaled)
      whh_ref : (L, H, 4H)     hidden->hidden weights (transposed, gate-scaled)
      b_ref   : (L, 1, 4H)     combined bias (b_ih + b_hh) per layer (gate-scaled)
      ga_ref  : (1, 4H)        per-lane affine 'a' for tanh->gate fixup
      gb_ref  : (1, 4H)        per-lane affine 'b' for tanh->gate fixup
      wfc_ref : (H, O)         FC weights (transposed)
      bfc_ref : (1, O)         FC bias
      out_ref : (B, O)         model output
    """
    T, B = x_ref.shape[0], x_ref.shape[1]
    L, H = whh_ref.shape[0], whh_ref.shape[1]
    G = 4 * H

    # Hoisted per-lane affine constants (broadcast once; JAX does not CSE these).
    gate_a = jnp.broadcast_to(ga_ref[...], (B, G))
    gate_b = jnp.broadcast_to(gb_ref[...], (B, G))

    # Layer-0 inputs: static time slices of the raw input (stay in vregs).
    xs = [x_ref[t] for t in range(T)]          # each (B, I)

    h = None
    for l in range(L):
        wih = wih0_ref[...] if l == 0 else wihr_ref[l - 1]   # (I or H, 4H)
        whh = whh_ref[l]                                     # (H, 4H)
        bias = jnp.broadcast_to(b_ref[l], (B, G))            # hoisted broadcast

        # Hoisted input projection (+ bias): independent across t, computed
        # outside the recurrence so only h @ Whh remains on the serial path.
        xw = [
            jnp.dot(xs[t], wih, preferred_element_type=jnp.float32) + bias
            for t in range(T)
        ]

        # Serial recurrence, fully unrolled (T = 8).
        h = jnp.zeros((B, H), jnp.float32)
        c = jnp.zeros((B, H), jnp.float32)
        hs = []
        for t in range(T):
            gates = xw[t] + jnp.dot(h, whh, preferred_element_type=jnp.float32)
            # One tanh over the whole 4H-wide gate vector, then a per-lane FMA:
            #   i,f,o lanes -> 0.5*tanh(z/2)+0.5 == sigmoid(z)   (scale folded in W)
            #   g     lanes -> 1.0*tanh(z)  +0.0
            act = jnp.tanh(gates) * gate_a + gate_b
            i_g = act[:, 0 * H:1 * H]
            f_g = act[:, 1 * H:2 * H]
            g_g = act[:, 2 * H:3 * H]
            o_g = act[:, 3 * H:4 * H]
            c = f_g * c + i_g * g_g
            h = o_g * jnp.tanh(c)
            hs.append(h)
        xs = hs   # this layer's hidden sequence feeds the next layer

    # FC head on the last time step of the last layer (== out[:, -1, :]).
    out_ref[...] = (
        jnp.dot(h, wfc_ref[...], preferred_element_type=jnp.float32)
        + bfc_ref[...]
    )


# ----------------------------------------------------------------------------
# Wrappers
# ----------------------------------------------------------------------------
def _prepare_fused_params(params):
    """Transpose / stack PyTorch-layout weights into the kernel's layout, and
    fold the sigmoid half-scaling (sigmoid(z) = 0.5 + 0.5*tanh(z/2)) into the
    i/f/o gate columns so the kernel only needs one tanh per cell."""
    layers = list(params["lstm_1"]) + list(params["lstm_2"])
    H = layers[0]["w_hh"].shape[1]
    G = 4 * H

    # Per-lane gate constants (gate order: i, f, g, o along the 4H lane axis).
    half = jnp.full((H,), 0.5, jnp.float32)
    one = jnp.ones((H,), jnp.float32)
    zero = jnp.zeros((H,), jnp.float32)
    scale = jnp.concatenate([half, half, one, half])    # input scaling (folded into W)
    gate_a = jnp.concatenate([half, half, one, half]).reshape(1, G)
    gate_b = jnp.concatenate([half, half, zero, half]).reshape(1, G)

    wih0 = jnp.transpose(layers[0]["w_ih"]) * scale                           # (I, 4H)
    wihr = jnp.stack([jnp.transpose(p["w_ih"]) * scale for p in layers[1:]])  # (L-1, H, 4H)
    whh = jnp.stack([jnp.transpose(p["w_hh"]) * scale for p in layers])       # (L, H, 4H)
    bias = jnp.stack(
        [((p["b_ih"] + p["b_hh"]) * scale).reshape(1, G) for p in layers]     # (L, 1, 4H)
    )
    wfc = jnp.transpose(params["fc"]["w"])                                    # (H, O)
    bfc = params["fc"]["b"].reshape(1, -1)                                    # (1, O)
    return wih0, wihr, whh, bias, gate_a, gate_b, wfc, bfc


@jax.jit
def lstm_forward(params, x_btf):
    """Full model forward.  x_btf: (B, T, input_dim) batch_first, like PyTorch."""
    wih0, wihr, whh, bias, gate_a, gate_b, wfc, bfc = _prepare_fused_params(params)
    x_tm = jnp.transpose(x_btf, (1, 0, 2)).astype(jnp.float32)  # (T, B, I)
    B = x_tm.shape[1]
    O = wfc.shape[1]

    vmem_spec = pl.BlockSpec(memory_space=pltpu.MemorySpace.VMEM)
    return pl.pallas_call(
        fused_lstm_kernel,
        out_shape=jax.ShapeDtypeStruct((B, O), jnp.float32),
        in_specs=[vmem_spec] * 9,
        out_specs=vmem_spec,
    )(x_tm, wih0, wihr, whh, bias, gate_a, gate_b, wfc, bfc)


def init_params(key, input_dim, hidden_dim, num_layers, output_dim):
    """Deterministic parameter init matching PyTorch shapes (uniform +-1/sqrt(H))."""
    k = 1.0 / jnp.sqrt(jnp.float32(hidden_dim))
    params = {"lstm_1": [], "lstm_2": []}

    def u(key, shape):
        return jax.random.uniform(key, shape, jnp.float32, -k, k)

    for stack, first_in in (("lstm_1", input_dim), ("lstm_2", hidden_dim)):
        for layer in range(num_layers):
            in_dim = first_in if layer == 0 else hidden_dim
            key, k1, k2, k3, k4 = jax.random.split(key, 5)
            params[stack].append(
                dict(
                    w_ih=u(k1, (4 * hidden_dim, in_dim)),
                    w_hh=u(k2, (4 * hidden_dim, hidden_dim)),
                    b_ih=u(k3, (4 * hidden_dim,)),
                    b_hh=u(k4, (4 * hidden_dim,)),
                )
            )
    key, k1, k2 = jax.random.split(key, 3)
    params["fc"] = dict(
        w=u(k1, (output_dim, hidden_dim)),
        b=u(k2, (output_dim,)),
    )
    return params


# ----------------------------------------------------------------------------
# Pure-JAX reference (silent correctness check, uses UNMODIFIED params)
# ----------------------------------------------------------------------------
def _ref_lstm_layer(x_tm, w_ih, w_hh, b_ih, b_hh):
    T, B, _ = x_tm.shape
    H = w_hh.shape[1]

    def step(carry, x_t):
        h, c = carry
        gates = x_t @ w_ih.T + h @ w_hh.T + b_ih + b_hh
        i = jax.nn.sigmoid(gates[:, 0 * H:1 * H])
        f = jax.nn.sigmoid(gates[:, 1 * H:2 * H])
        g = jnp.tanh(gates[:, 2 * H:3 * H])
        o = jax.nn.sigmoid(gates[:, 3 * H:4 * H])
        c = f * c + i * g
        h = o * jnp.tanh(c)
        return (h, c), h

    init = (jnp.zeros((B, H), jnp.float32), jnp.zeros((B, H), jnp.float32))
    _, hs = jax.lax.scan(step, init, x_tm)
    return hs


def _ref_forward(params, x_btf):
    cur = jnp.transpose(x_btf, (1, 0, 2))
    for p in params["lstm_1"]:
        cur = _ref_lstm_layer(cur, p["w_ih"], p["w_hh"], p["b_ih"], p["b_hh"])
    for p in params["lstm_2"]:
        cur = _ref_lstm_layer(cur, p["w_ih"], p["w_hh"], p["b_ih"], p["b_hh"])
    return cur[-1] @ params["fc"]["w"].T + params["fc"]["b"]


# ----------------------------------------------------------------------------
if __name__ == "__main__":
    # Small shapes consistent with the module's forward.
    batch, seq_len = 2, 8
    input_dim, hidden_dim, num_layers, output_dim = 4, 32, 2, 1

    key = jax.random.PRNGKey(0)
    key, pkey, xkey = jax.random.split(key, 3)
    params = init_params(pkey, input_dim, hidden_dim, num_layers, output_dim)
    x = jax.random.normal(xkey, (batch, seq_len, input_dim), jnp.float32)

    out = jax.block_until_ready(lstm_forward(params, x))
    ref = jax.block_until_ready(_ref_forward(params, x))

    assert out.shape == (batch, output_dim)
    assert jnp.allclose(out, ref, atol=5e-5, rtol=5e-5), (out, ref)

    print("KERNEL_OK")
</pallas_src>

<mosaic_0001>
module attributes {stable_mosaic.version = 11 : i64} {
  func.func @fused_lstm_kernel(%arg0: memref<8x2x4xf32, #tpu.memory_space<vmem>>, %arg1: memref<4x128xf32, #tpu.memory_space<vmem>>, %arg2: memref<3x32x128xf32, #tpu.memory_space<vmem>>, %arg3: memref<4x32x128xf32, #tpu.memory_space<vmem>>, %arg4: memref<4x1x128xf32, #tpu.memory_space<vmem>>, %arg5: memref<1x128xf32, #tpu.memory_space<vmem>>, %arg6: memref<1x128xf32, #tpu.memory_space<vmem>>, %arg7: memref<32x1xf32, #tpu.memory_space<vmem>>, %arg8: memref<1x1xf32, #tpu.memory_space<vmem>>, %arg9: memref<2x1xf32, #tpu.memory_space<vmem>>) attributes {dimension_semantics = [], scalar_prefetch = 0 : i64, scratch_operands = 0 : i64, tpu.core_type = #tpu.core_type<tc>} {
    %c0 = arith.constant 0 : index
    %c0_0 = arith.constant 0 : index
    %0 = vector.load %arg5[%c0, %c0_0] : memref<1x128xf32, #tpu.memory_space<vmem>>, vector<1x128xf32>
    %1 = vector.shape_cast %0 : vector<1x128xf32> to vector<1x128xf32>
    %2 = vector.broadcast %1 : vector<1x128xf32> to vector<2x128xf32>
    %c0_1 = arith.constant 0 : index
    %c0_2 = arith.constant 0 : index
    %3 = vector.load %arg6[%c0_1, %c0_2] : memref<1x128xf32, #tpu.memory_space<vmem>>, vector<1x128xf32>
    %4 = vector.shape_cast %3 : vector<1x128xf32> to vector<1x128xf32>
    %5 = vector.broadcast %4 : vector<1x128xf32> to vector<2x128xf32>
    %c0_3 = arith.constant 0 : index
    %c0_4 = arith.constant 0 : index
    %c0_5 = arith.constant 0 : index
    %6 = vector.load %arg0[%c0_3, %c0_4, %c0_5] : memref<8x2x4xf32, #tpu.memory_space<vmem>>, vector<1x2x4xf32>
    %7 = vector.shape_cast %6 : vector<1x2x4xf32> to vector<2x4xf32>
    %c1 = arith.constant 1 : index
    %c0_6 = arith.constant 0 : index
    %c0_7 = arith.constant 0 : index
    %8 = vector.load %arg0[%c1, %c0_6, %c0_7] : memref<8x2x4xf32, #tpu.memory_space<vmem>>, vector<1x2x4xf32>
    %9 = vector.shape_cast %8 : vector<1x2x4xf32> to vector<2x4xf32>
    %c2 = arith.constant 2 : index
    %c0_8 = arith.constant 0 : index
    %c0_9 = arith.constant 0 : index
    %10 = vector.load %arg0[%c2, %c0_8, %c0_9] : memref<8x2x4xf32, #tpu.memory_space<vmem>>, vector<1x2x4xf32>
    %11 = vector.shape_cast %10 : vector<1x2x4xf32> to vector<2x4xf32>
    %c3 = arith.constant 3 : index
    %c0_10 = arith.constant 0 : index
    %c0_11 = arith.constant 0 : index
    %12 = vector.load %arg0[%c3, %c0_10, %c0_11] : memref<8x2x4xf32, #tpu.memory_space<vmem>>, vector<1x2x4xf32>
    %13 = vector.shape_cast %12 : vector<1x2x4xf32> to vector<2x4xf32>
    %c4 = arith.constant 4 : index
    %c0_12 = arith.constant 0 : index
    %c0_13 = arith.constant 0 : index
    %14 = vector.load %arg0[%c4, %c0_12, %c0_13] : memref<8x2x4xf32, #tpu.memory_space<vmem>>, vector<1x2x4xf32>
    %15 = vector.shape_cast %14 : vector<1x2x4xf32> to vector<2x4xf32>
    %c5 = arith.constant 5 : index
    %c0_14 = arith.constant 0 : index
    %c0_15 = arith.constant 0 : index
    %16 = vector.load %arg0[%c5, %c0_14, %c0_15] : memref<8x2x4xf32, #tpu.memory_space<vmem>>, vector<1x2x4xf32>
    %17 = vector.shape_cast %16 : vector<1x2x4xf32> to vector<2x4xf32>
    %c6 = arith.constant 6 : index
    %c0_16 = arith.constant 0 : index
    %c0_17 = arith.constant 0 : index
    %18 = vector.load %arg0[%c6, %c0_16, %c0_17] : memref<8x2x4xf32, #tpu.memory_space<vmem>>, vector<1x2x4xf32>
    %19 = vector.shape_cast %18 : vector<1x2x4xf32> to vector<2x4xf32>
    %c7 = arith.constant 7 : index
    %c0_18 = arith.constant 0 : index
    %c0_19 = arith.constant 0 : index
    %20 = vector.load %arg0[%c7, %c0_18, %c0_19] : memref<8x2x4xf32, #tpu.memory_space<vmem>>, vector<1x2x4xf32>
    %21 = vector.shape_cast %20 : vector<1x2x4xf32> to vector<2x4xf32>
    %c0_20 = arith.constant 0 : index
    %c0_21 = arith.constant 0 : index
    %22 = vector.load %arg1[%c0_20, %c0_21] : memref<4x128xf32, #tpu.memory_space<vmem>>, vector<4x128xf32>
    %c0_22 = arith.constant 0 : index
    %c0_23 = arith.constant 0 : index
    %c0_24 = arith.constant 0 : index
    %23 = vector.load %arg3[%c0_22, %c0_23, %c0_24] : memref<4x32x128xf32, #tpu.memory_space<vmem>>, vector<1x32x128xf32>
    %24 = vector.shape_cast %23 : vector<1x32x128xf32> to vector<32x128xf32>
    %c0_25 = arith.constant 0 : index
    %c0_26 = arith.constant 0 : index
    %c0_27 = arith.constant 0 : index
    %25 = vector.load %arg4[%c0_25, %c0_26, %c0_27] : memref<4x1x128xf32, #tpu.memory_space<vmem>>, vector<1x1x128xf32>
    %26 = vector.shape_cast %25 : vector<1x1x128xf32> to vector<1x128xf32>
    %27 = vector.shape_cast %26 : vector<1x128xf32> to vector<1x128xf32>
    %28 = vector.broadcast %27 : vector<1x128xf32> to vector<2x128xf32>
    %cst = arith.constant dense<0.000000e+00> : vector<2x128xf32>
    %29 = tpu.matmul %7, %22, %cst {dimension_numbers = #tpu.dot_dimension_numbers<[1], [0], [0], [1], [0, 0, 1, 1], [], []>} : vector<2x4xf32>, vector<4x128xf32>, vector<2x128xf32> -> vector<2x128xf32>
    %30 = arith.addf %29, %28 : vector<2x128xf32>
    %cst_28 = arith.constant dense<0.000000e+00> : vector<2x128xf32>
    %31 = tpu.matmul %9, %22, %cst_28 {dimension_numbers = #tpu.dot_dimension_numbers<[1], [0], [0], [1], [0, 0, 1, 1], [], []>} : vector<2x4xf32>, vector<4x128xf32>, vector<2x128xf32> -> vector<2x128xf32>
    %32 = arith.addf %31, %28 : vector<2x128xf32>
    %cst_29 = arith.constant dense<0.000000e+00> : vector<2x128xf32>
    %33 = tpu.matmul %11, %22, %cst_29 {dimension_numbers = #tpu.dot_dimension_numbers<[1], [0], [0], [1], [0, 0, 1, 1], [], []>} : vector<2x4xf32>, vector<4x128xf32>, vector<2x128xf32> -> vector<2x128xf32>
    %34 = arith.addf %33, %28 : vector<2x128xf32>
    %cst_30 = arith.constant dense<0.000000e+00> : vector<2x128xf32>
    %35 = tpu.matmul %13, %22, %cst_30 {dimension_numbers = #tpu.dot_dimension_numbers<[1], [0], [0], [1], [0, 0, 1, 1], [], []>} : vector<2x4xf32>, vector<4x128xf32>, vector<2x128xf32> -> vector<2x128xf32>
    %36 = arith.addf %35, %28 : vector<2x128xf32>
    %cst_31 = arith.constant dense<0.000000e+00> : vector<2x128xf32>
    %37 = tpu.matmul %15, %22, %cst_31 {dimension_numbers = #tpu.dot_dimension_numbers<[1], [0], [0], [1], [0, 0, 1, 1], [], []>} : vector<2x4xf32>, vector<4x128xf32>, vector<2x128xf32> -> vector<2x128xf32>
    %38 = arith.addf %37, %28 : vector<2x128xf32>
    %cst_32 = arith.constant dense<0.000000e+00> : vector<2x128xf32>
    %39 = tpu.matmul %17, %22, %cst_32 {dimension_numbers = #tpu.dot_dimension_numbers<[1], [0], [0], [1], [0, 0, 1, 1], [], []>} : vector<2x4xf32>, vector<4x128xf32>, vector<2x128xf32> -> vector<2x128xf32>
    %40 = arith.addf %39, %28 : vector<2x128xf32>
    %cst_33 = arith.constant dense<0.000000e+00> : vector<2x128xf32>
    %41 = tpu.matmul %19, %22, %cst_33 {dimension_numbers = #tpu.dot_dimension_numbers<[1], [0], [0], [1], [0, 0, 1, 1], [], []>} : vector<2x4xf32>, vector<4x128xf32>, vector<2x128xf32> -> vector<2x128xf32>
    %42 = arith.addf %41, %28 : vector<2x128xf32>
    %cst_34 = arith.constant dense<0.000000e+00> : vector<2x128xf32>
    %43 = tpu.matmul %21, %22, %cst_34 {dimension_numbers = #tpu.dot_dimension_numbers<[1], [0], [0], [1], [0, 0, 1, 1], [], []>} : vector<2x4xf32>, vector<4x128xf32>, vector<2x128xf32> -> vector<2x128xf32>
    %44 = arith.addf %43, %28 : vector<2x128xf32>
    %cst_35 = arith.constant 0.000000e+00 : f32
    %45 = vector.broadcast %cst_35 : f32 to vector<2x32xf32>
    %cst_36 = arith.constant 0.000000e+00 : f32
    %46 = vector.broadcast %cst_36 : f32 to vector<2x32xf32>
    %cst_37 = arith.constant dense<0.000000e+00> : vector<2x128xf32>
    %47 = tpu.matmul %45, %24, %cst_37 {dimension_numbers = #tpu.dot_dimension_numbers<[1], [0], [0], [1], [0, 0, 1, 1], [], []>} : vector<2x32xf32>, vector<32x128xf32>, vector<2x128xf32> -> vector<2x128xf32>
    %48 = arith.addf %30, %47 : vector<2x128xf32>
    %49 = math.tanh %48 : vector<2x128xf32>
    %50 = arith.mulf %49, %2 : vector<2x128xf32>
    %51 = arith.addf %50, %5 : vector<2x128xf32>
    %52 = vector.extract_strided_slice %51 {offsets = [0, 0], sizes = [2, 32], strides = [1, 1]} : vector<2x128xf32> to vector<2x32xf32>
    %53 = vector.extract_strided_slice %51 {offsets = [0, 32], sizes = [2, 32], strides = [1, 1]} : vector<2x128xf32> to vector<2x32xf32>
    %54 = vector.extract_strided_slice %51 {offsets = [0, 64], sizes = [2, 32], strides = [1, 1]} : vector<2x128xf32> to vector<2x32xf32>
    %55 = vector.extract_strided_slice %51 {offsets = [0, 96], sizes = [2, 32], strides = [1, 1]} : vector<2x128xf32> to vector<2x32xf32>
    %56 = arith.mulf %53, %46 : vector<2x32xf32>
    %57 = arith.mulf %52, %54 : vector<2x32xf32>
    %58 = arith.addf %56, %57 : vector<2x32xf32>
    %59 = math.tanh %58 : vector<2x32xf32>
    %60 = arith.mulf %55, %59 : vector<2x32xf32>
    %cst_38 = arith.constant dense<0.000000e+00> : vector<2x128xf32>
    %61 = tpu.matmul %60, %24, %cst_38 {dimension_numbers = #tpu.dot_dimension_numbers<[1], [0], [0], [1], [0, 0, 1, 1], [], []>} : vector<2x32xf32>, vector<32x128xf32>, vector<2x128xf32> -> vector<2x128xf32>
    %62 = arith.addf %32, %61 : vector<2x128xf32>
    %63 = math.tanh %62 : vector<2x128xf32>
    %64 = arith.mulf %63, %2 : vector<2x128xf32>
    %65 = arith.addf %64, %5 : vector<2x128xf32>
    %66 = vector.extract_strided_slice %65 {offsets = [0, 0], sizes = [2, 32], strides = [1, 1]} : vector<2x128xf32> to vector<2x32xf32>
    %67 = vector.extract_strided_slice %65 {offsets = [0, 32], sizes = [2, 32], strides = [1, 1]} : vector<2x128xf32> to vector<2x32xf32>
    %68 = vector.extract_strided_slice %65 {offsets = [0, 64], sizes = [2, 32], strides = [1, 1]} : vector<2x128xf32> to vector<2x32xf32>
    %69 = vector.extract_strided_slice %65 {offsets = [0, 96], sizes = [2, 32], strides = [1, 1]} : vector<2x128xf32> to vector<2x32xf32>
    %70 = arith.mulf %67, %58 : vector<2x32xf32>
    %71 = arith.mulf %66, %68 : vector<2x32xf32>
    %72 = arith.addf %70, %71 : vector<2x32xf32>
    %73 = math.tanh %72 : vector<2x32xf32>
    %74 = arith.mulf %69, %73 : vector<2x32xf32>
    %cst_39 = arith.constant dense<0.000000e+00> : vector<2x128xf32>
    %75 = tpu.matmul %74, %24, %cst_39 {dimension_numbers = #tpu.dot_dimension_numbers<[1], [0], [0], [1], [0, 0, 1, 1], [], []>} : vector<2x32xf32>, vector<32x128xf32>, vector<2x128xf32> -> vector<2x128xf32>
    %76 = arith.addf %34, %75 : vector<2x128xf32>
    %77 = math.tanh %76 : vector<2x128xf32>
    %78 = arith.mulf %77, %2 : vector<2x128xf32>
    %79 = arith.addf %78, %5 : vector<2x128xf32>
    %80 = vector.extract_strided_slice %79 {offsets = [0, 0], sizes = [2, 32], strides = [1, 1]} : vector<2x128xf32> to vector<2x32xf32>
    %81 = vector.extract_strided_slice %79 {offsets = [0, 32], sizes = [2, 32], strides = [1, 1]} : vector<2x128xf32> to vector<2x32xf32>
    %82 = vector.extract_strided_slice %79 {offsets = [0, 64], sizes = [2, 32], strides = [1, 1]} : vector<2x128xf32> to vector<2x32xf32>
    %83 = vector.extract_strided_slice %79 {offsets = [0, 96], sizes = [2, 32], strides = [1, 1]} : vector<2x128xf32> to vector<2x32xf32>
    %84 = arith.mulf %81, %72 : vector<2x32xf32>
    %85 = arith.mulf %80, %82 : vector<2x32xf32>
    %86 = arith.addf %84, %85 : vector<2x32xf32>
    %87 = math.tanh %86 : vector<2x32xf32>
    %88 = arith.mulf %83, %87 : vector<2x32xf32>
    %cst_40 = arith.constant dense<0.000000e+00> : vector<2x128xf32>
    %89 = tpu.matmul %88, %24, %cst_40 {dimension_numbers = #tpu.dot_dimension_numbers<[1], [0], [0], [1], [0, 0, 1, 1], [], []>} : vector<2x32xf32>, vector<32x128xf32>, vector<2x128xf32> -> vector<2x128xf32>
    %90 = arith.addf %36, %89 : vector<2x128xf32>
    %91 = math.tanh %90 : vector<2x128xf32>
    %92 = arith.mulf %91, %2 : vector<2x128xf32>
    %93 = arith.addf %92, %5 : vector<2x128xf32>
    %94 = vector.extract_strided_slice %93 {offsets = [0, 0], sizes = [2, 32], strides = [1, 1]} : vector<2x128xf32> to vector<2x32xf32>
    %95 = vector.extract_strided_slice %93 {offsets = [0, 32], sizes = [2, 32], strides = [1, 1]} : vector<2x128xf32> to vector<2x32xf32>
    %96 = vector.extract_strided_slice %93 {offsets = [0, 64], sizes = [2, 32], strides = [1, 1]} : vector<2x128xf32> to vector<2x32xf32>
    %97 = vector.extract_strided_slice %93 {offsets = [0, 96], sizes = [2, 32], strides = [1, 1]} : vector<2x128xf32> to vector<2x32xf32>
    %98 = arith.mulf %95, %86 : vector<2x32xf32>
    %99 = arith.mulf %94, %96 : vector<2x32xf32>
    %100 = arith.addf %98, %99 : vector<2x32xf32>
    %101 = math.tanh %100 : vector<2x32xf32>
    %102 = arith.mulf %97, %101 : vector<2x32xf32>
    %cst_41 = arith.constant dense<0.000000e+00> : vector<2x128xf32>
    %103 = tpu.matmul %102, %24, %cst_41 {dimension_numbers = #tpu.dot_dimension_numbers<[1], [0], [0], [1], [0, 0, 1, 1], [], []>} : vector<2x32xf32>, vector<32x128xf32>, vector<2x128xf32> -> vector<2x128xf32>
    %104 = arith.addf %38, %103 : vector<2x128xf32>
    %105 = math.tanh %104 : vector<2x128xf32>
    %106 = arith.mulf %105, %2 : vector<2x128xf32>
    %107 = arith.addf %106, %5 : vector<2x128xf32>
    %108 = vector.extract_strided_slice %107 {offsets = [0, 0], sizes = [2, 32], strides = [1, 1]} : vector<2x128xf32> to vector<2x32xf32>
    %109 = vector.extract_strided_slice %107 {offsets = [0, 32], sizes = [2, 32], strides = [1, 1]} : vector<2x128xf32> to vector<2x32xf32>
    %110 = vector.extract_strided_slice %107 {offsets = [0, 64], sizes = [2, 32], strides = [1, 1]} : vector<2x128xf32> to vector<2x32xf32>
    %111 = vector.extract_strided_slice %107 {offsets = [0, 96], sizes = [2, 32], strides = [1, 1]} : vector<2x128xf32> to vector<2x32xf32>
    %112 = arith.mulf %109, %100 : vector<2x32xf32>
    %113 = arith.mulf %108, %110 : vector<2x32xf32>
    %114 = arith.addf %112, %113 : vector<2x32xf32>
    %115 = math.tanh %114 : vector<2x32xf32>
    %116 = arith.mulf %111, %115 : vector<2x32xf32>
    %cst_42 = arith.constant dense<0.000000e+00> : vector<2x128xf32>
    %117 = tpu.matmul %116, %24, %cst_42 {dimension_numbers = #tpu.dot_dimension_numbers<[1], [0], [0], [1], [0, 0, 1, 1], [], []>} : vector<2x32xf32>, vector<32x128xf32>, vector<2x128xf32> -> vector<2x128xf32>
    %118 = arith.addf %40, %117 : vector<2x128xf32>
    %119 = math.tanh %118 : vector<2x128xf32>
    %120 = arith.mulf %119, %2 : vector<2x128xf32>
    %121 = arith.addf %120, %5 : vector<2x128xf32>
    %122 = vector.extract_strided_slice %121 {offsets = [0, 0], sizes = [2, 32], strides = [1, 1]} : vector<2x128xf32> to vector<2x32xf32>
    %123 = vector.extract_strided_slice %121 {offsets = [0, 32], sizes = [2, 32], strides = [1, 1]} : vector<2x128xf32> to vector<2x32xf32>
    %124 = vector.extract_strided_slice %121 {offsets = [0, 64], sizes = [2, 32], strides = [1, 1]} : vector<2x128xf32> to vector<2x32xf32>
    %125 = vector.extract_strided_slice %121 {offsets = [0, 96], sizes = [2, 32], strides = [1, 1]} : vector<2x128xf32> to vector<2x32xf32>
    %126 = arith.mulf %123, %114 : vector<2x32xf32>
    %127 = arith.mulf %122, %124 : vector<2x32xf32>
    %128 = arith.addf %126, %127 : vector<2x32xf32>
    %129 = math.tanh %128 : vector<2x32xf32>
    %130 = arith.mulf %125, %129 : vector<2x32xf32>
    %cst_43 = arith.constant dense<0.000000e+00> : vector<2x128xf32>
    %131 = tpu.matmul %130, %24, %cst_43 {dimension_numbers = #tpu.dot_dimension_numbers<[1], [0], [0], [1], [0, 0, 1, 1], [], []>} : vector<2x32xf32>, vector<32x128xf32>, vector<2x128xf32> -> vector<2x128xf32>
    %132 = arith.addf %42, %131 : vector<2x128xf32>
    %133 = math.tanh %132 : vector<2x128xf32>
    %134 = arith.mulf %133, %2 : vector<2x128xf32>
    %135 = arith.addf %134, %5 : vector<2x128xf32>
    %136 = vector.extract_strided_slice %135 {offsets = [0, 0], sizes = [2, 32], strides = [1, 1]} : vector<2x128xf32> to vector<2x32xf32>
    %137 = vector.extract_strided_slice %135 {offsets = [0, 32], sizes = [2, 32], strides = [1, 1]} : vector<2x128xf32> to vector<2x32xf32>
    %138 = vector.extract_strided_slice %135 {offsets = [0, 64], sizes = [2, 32], strides = [1, 1]} : vector<2x128xf32> to vector<2x32xf32>
    %139 = vector.extract_strided_slice %135 {offsets = [0, 96], sizes = [2, 32], strides = [1, 1]} : vector<2x128xf32> to vector<2x32xf32>
    %140 = arith.mulf %137, %128 : vector<2x32xf32>
    %141 = arith.mulf %136, %138 : vector<2x32xf32>
    %142 = arith.addf %140, %141 : vector<2x32xf32>
    %143 = math.tanh %142 : vector<2x32xf32>
    %144 = arith.mulf %139, %143 : vector<2x32xf32>
    %cst_44 = arith.constant dense<0.000000e+00> : vector<2x128xf32>
    %145 = tpu.matmul %144, %24, %cst_44 {dimension_numbers = #tpu.dot_dimension_numbers<[1], [0], [0], [1], [0, 0, 1, 1], [], []>} : vector<2x32xf32>, vector<32x128xf32>, vector<2x128xf32> -> vector<2x128xf32>
    %146 = arith.addf %44, %145 : vector<2x128xf32>
    %147 = math.tanh %146 : vector<2x128xf32>
    %148 = arith.mulf %147, %2 : vector<2x128xf32>
    %149 = arith.addf %148, %5 : vector<2x128xf32>
    %150 = vector.extract_strided_slice %149 {offsets = [0, 0], sizes = [2, 32], strides = [1, 1]} : vector<2x128xf32> to vector<2x32xf32>
    %151 = vector.extract_strided_slice %149 {offsets = [0, 32], sizes = [2, 32], strides = [1, 1]} : vector<2x128xf32> to vector<2x32xf32>
    %152 = vector.extract_strided_slice %149 {offsets = [0, 64], sizes = [2, 32], strides = [1, 1]} : vector<2x128xf32> to vector<2x32xf32>
    %153 = vector.extract_strided_slice %149 {offsets = [0, 96], sizes = [2, 32], strides = [1, 1]} : vector<2x128xf32> to vector<2x32xf32>
    %154 = arith.mulf %151, %142 : vector<2x32xf32>
    %155 = arith.mulf %150, %152 : vector<2x32xf32>
    %156 = arith.addf %154, %155 : vector<2x32xf32>
    %157 = math.tanh %156 : vector<2x32xf32>
    %158 = arith.mulf %153, %157 : vector<2x32xf32>
    %c0_45 = arith.constant 0 : index
    %c0_46 = arith.constant 0 : index
    %c0_47 = arith.constant 0 : index
    %159 = vector.load %arg2[%c0_45, %c0_46, %c0_47] : memref<3x32x128xf32, #tpu.memory_space<vmem>>, vector<1x32x128xf32>
    %160 = vector.shape_cast %159 : vector<1x32x128xf32> to vector<32x128xf32>
    %c1_48 = arith.constant 1 : index
    %c0_49 = arith.constant 0 : index
    %c0_50 = arith.constant 0 : index
    %161 = vector.load %arg3[%c1_48, %c0_49, %c0_50] : memref<4x32x128xf32, #tpu.memory_space<vmem>>, vector<1x32x128xf32>
    %162 = vector.shape_cast %161 : vector<1x32x128xf32> to vector<32x128xf32>
    %c1_51 = arith.constant 1 : index
    %c0_52 = arith.constant 0 : index
    %c0_53 = arith.constant 0 : index
    %163 = vector.load %arg4[%c1_51, %c0_52, %c0_53] : memref<4x1x128xf32, #tpu.memory_space<vmem>>, vector<1x1x128xf32>
    %164 = vector.shape_cast %163 : vector<1x1x128xf32> to vector<1x128xf32>
    %165 = vector.shape_cast %164 : vector<1x128xf32> to vector<1x128xf32>
    %166 = vector.broadcast %165 : vector<1x128xf32> to vector<2x128xf32>
    %cst_54 = arith.constant dense<0.000000e+00> : vector<2x128xf32>
    %167 = tpu.matmul %60, %160, %cst_54 {dimension_numbers = #tpu.dot_dimension_numbers<[1], [0], [0], [1], [0, 0, 1, 1], [], []>} : vector<2x32xf32>, vector<32x128xf32>, vector<2x128xf32> -> vector<2x128xf32>
    %168 = arith.addf %167, %166 : vector<2x128xf32>
    %cst_55 = arith.constant dense<0.000000e+00> : vector<2x128xf32>
    %169 = tpu.matmul %74, %160, %cst_55 {dimension_numbers = #tpu.dot_dimension_numbers<[1], [0], [0], [1], [0, 0, 1, 1], [], []>} : vector<2x32xf32>, vector<32x128xf32>, vector<2x128xf32> -> vector<2x128xf32>
    %170 = arith.addf %169, %166 : vector<2x128xf32>
    %cst_56 = arith.constant dense<0.000000e+00> : vector<2x128xf32>
    %171 = tpu.matmul %88, %160, %cst_56 {dimension_numbers = #tpu.dot_dimension_numbers<[1], [0], [0], [1], [0, 0, 1, 1], [], []>} : vector<2x32xf32>, vector<32x128xf32>, vector<2x128xf32> -> vector<2x128xf32>
    %172 = arith.addf %171, %166 : vector<2x128xf32>
    %cst_57 = arith.constant dense<0.000000e+00> : vector<2x128xf32>
    %173 = tpu.matmul %102, %160, %cst_57 {dimension_numbers = #tpu.dot_dimension_numbers<[1], [0], [0], [1], [0, 0, 1, 1], [], []>} : vector<2x32xf32>, vector<32x128xf32>, vector<2x128xf32> -> vector<2x128xf32>
    %174 = arith.addf %173, %166 : vector<2x128xf32>
    %cst_58 = arith.constant dense<0.000000e+00> : vector<2x128xf32>
    %175 = tpu.matmul %116, %160, %cst_58 {dimension_numbers = #tpu.dot_dimension_numbers<[1], [0], [0], [1], [0, 0, 1, 1], [], []>} : vector<2x32xf32>, vector<32x128xf32>, vector<2x128xf32> -> vector<2x128xf32>
    %176 = arith.addf %175, %166 : vector<2x128xf32>
    %cst_59 = arith.constant dense<0.000000e+00> : vector<2x128xf32>
    %177 = tpu.matmul %130, %160, %cst_59 {dimension_numbers = #tpu.dot_dimension_numbers<[1], [0], [0], [1], [0, 0, 1, 1], [], []>} : vector<2x32xf32>, vector<32x128xf32>, vector<2x128xf32> -> vector<2x128xf32>
    %178 = arith.addf %177, %166 : vector<2x128xf32>
    %cst_60 = arith.constant dense<0.000000e+00> : vector<2x128xf32>
    %179 = tpu.matmul %144, %160, %cst_60 {dimension_numbers = #tpu.dot_dimension_numbers<[1], [0], [0], [1], [0, 0, 1, 1], [], []>} : vector<2x32xf32>, vector<32x128xf32>, vector<2x128xf32> -> vector<2x128xf32>
    %180 = arith.addf %179, %166 : vector<2x128xf32>
    %cst_61 = arith.constant dense<0.000000e+00> : vector<2x128xf32>
    %181 = tpu.matmul %158, %160, %cst_61 {dimension_numbers = #tpu.dot_dimension_numbers<[1], [0], [0], [1], [0, 0, 1, 1], [], []>} : vector<2x32xf32>, vector<32x128xf32>, vector<2x128xf32> -> vector<2x128xf32>
    %182 = arith.addf %181, %166 : vector<2x128xf32>
    %cst_62 = arith.constant 0.000000e+00 : f32
    %183 = vector.broadcast %cst_62 : f32 to vector<2x32xf32>
    %cst_63 = arith.constant 0.000000e+00 : f32
    %184 = vector.broadcast %cst_63 : f32 to vector<2x32xf32>
    %cst_64 = arith.constant dense<0.000000e+00> : vector<2x128xf32>
    %185 = tpu.matmul %183, %162, %cst_64 {dimension_numbers = #tpu.dot_dimension_numbers<[1], [0], [0], [1], [0, 0, 1, 1], [], []>} : vector<2x32xf32>, vector<32x128xf32>, vector<2x128xf32> -> vector<2x128xf32>
    %186 = arith.addf %168, %185 : vector<2x128xf32>
    %187 = math.tanh %186 : vector<2x128xf32>
    %188 = arith.mulf %187, %2 : vector<2x128xf32>
    %189 = arith.addf %188, %5 : vector<2x128xf32>
    %190 = vector.extract_strided_slice %189 {offsets = [0, 0], sizes = [2, 32], strides = [1, 1]} : vector<2x128xf32> to vector<2x32xf32>
    %191 = vector.extract_strided_slice %189 {offsets = [0, 32], sizes = [2, 32], strides = [1, 1]} : vector<2x128xf32> to vector<2x32xf32>
    %192 = vector.extract_strided_slice %189 {offsets = [0, 64], sizes = [2, 32], strides = [1, 1]} : vector<2x128xf32> to vector<2x32xf32>
    %193 = vector.extract_strided_slice %189 {offsets = [0, 96], sizes = [2, 32], strides = [1, 1]} : vector<2x128xf32> to vector<2x32xf32>
    %194 = arith.mulf %191, %184 : vector<2x32xf32>
    %195 = arith.mulf %190, %192 : vector<2x32xf32>
    %196 = arith.addf %194, %195 : vector<2x32xf32>
    %197 = math.tanh %196 : vector<2x32xf32>
    %198 = arith.mulf %193, %197 : vector<2x32xf32>
    %cst_65 = arith.constant dense<0.000000e+00> : vector<2x128xf32>
    %199 = tpu.matmul %198, %162, %cst_65 {dimension_numbers = #tpu.dot_dimension_numbers<[1], [0], [0], [1], [0, 0, 1, 1], [], []>} : vector<2x32xf32>, vector<32x128xf32>, vector<2x128xf32> -> vector<2x128xf32>
    %200 = arith.addf %170, %199 : vector<2x128xf32>
    %201 = math.tanh %200 : vector<2x128xf32>
    %202 = arith.mulf %201, %2 : vector<2x128xf32>
    %203 = arith.addf %202, %5 : vector<2x128xf32>
    %204 = vector.extract_strided_slice %203 {offsets = [0, 0], sizes = [2, 32], strides = [1, 1]} : vector<2x128xf32> to vector<2x32xf32>
    %205 = vector.extract_strided_slice %203 {offsets = [0, 32], sizes = [2, 32], strides = [1, 1]} : vector<2x128xf32> to vector<2x32xf32>
    %206 = vector.extract_strided_slice %203 {offsets = [0, 64], sizes = [2, 32], strides = [1, 1]} : vector<2x128xf32> to vector<2x32xf32>
    %207 = vector.extract_strided_slice %203 {offsets = [0, 96], sizes = [2, 32], strides = [1, 1]} : vector<2x128xf32> to vector<2x32xf32>
    %208 = arith.mulf %205, %196 : vector<2x32xf32>
    %209 = arith.mulf %204, %206 : vector<2x32xf32>
    %210 = arith.addf %208, %209 : vector<2x32xf32>
    %211 = math.tanh %210 : vector<2x32xf32>
    %212 = arith.mulf %207, %211 : vector<2x32xf32>
    %cst_66 = arith.constant dense<0.000000e+00> : vector<2x128xf32>
    %213 = tpu.matmul %212, %162, %cst_66 {dimension_numbers = #tpu.dot_dimension_numbers<[1], [0], [0], [1], [0, 0, 1, 1], [], []>} : vector<2x32xf32>, vector<32x128xf32>, vector<2x128xf32> -> vector<2x128xf32>
    %214 = arith.addf %172, %213 : vector<2x128xf32>
    %215 = math.tanh %214 : vector<2x128xf32>
    %216 = arith.mulf %215, %2 : vector<2x128xf32>
    %217 = arith.addf %216, %5 : vector<2x128xf32>
    %218 = vector.extract_strided_slice %217 {offsets = [0, 0], sizes = [2, 32], strides = [1, 1]} : vector<2x128xf32> to vector<2x32xf32>
    %219 = vector.extract_strided_slice %217 {offsets = [0, 32], sizes = [2, 32], strides = [1, 1]} : vector<2x128xf32> to vector<2x32xf32>
    %220 = vector.extract_strided_slice %217 {offsets = [0, 64], sizes = [2, 32], strides = [1, 1]} : vector<2x128xf32> to vector<2x32xf32>
    %221 = vector.extract_strided_slice %217 {offsets = [0, 96], sizes = [2, 32], strides = [1, 1]} : vector<2x128xf32> to vector<2x32xf32>
    %222 = arith.mulf %219, %210 : vector<2x32xf32>
    %223 = arith.mulf %218, %220 : vector<2x32xf32>
    %224 = arith.addf %222, %223 : vector<2x32xf32>
    %225 = math.tanh %224 : vector<2x32xf32>
    %226 = arith.mulf %221, %225 : vector<2x32xf32>
    %cst_67 = arith.constant dense<0.000000e+00> : vector<2x128xf32>
    %227 = tpu.matmul %226, %162, %cst_67 {dimension_numbers = #tpu.dot_dimension_numbers<[1], [0], [0], [1], [0, 0, 1, 1], [], []>} : vector<2x32xf32>, vector<32x128xf32>, vector<2x128xf32> -> vector<2x128xf32>
    %228 = arith.addf %174, %227 : vector<2x128xf32>
    %229 = math.tanh %228 : vector<2x128xf32>
    %230 = arith.mulf %229, %2 : vector<2x128xf32>
    %231 = arith.addf %230, %5 : vector<2x128xf32>
    %232 = vector.extract_strided_slice %231 {offsets = [0, 0], sizes = [2, 32], strides = [1, 1]} : vector<2x128xf32> to vector<2x32xf32>
    %233 = vector.extract_strided_slice %231 {offsets = [0, 32], sizes = [2, 32], strides = [1, 1]} : vector<2x128xf32> to vector<2x32xf32>
    %234 = vector.extract_strided_slice %231 {offsets = [0, 64], sizes = [2, 32], strides = [1, 1]} : vector<2x128xf32> to vector<2x32xf32>
    %235 = vector.extract_strided_slice %231 {offsets = [0, 96], sizes = [2, 32], strides = [1, 1]} : vector<2x128xf32> to vector<2x32xf32>
    %236 = arith.mulf %233, %224 : vector<2x32xf32>
    %237 = arith.mulf %232, %234 : vector<2x32xf32>
    %238 = arith.addf %236, %237 : vector<2x32xf32>
    %239 = math.tanh %238 : vector<2x32xf32>
    %240 = arith.mulf %235, %239 : vector<2x32xf32>
    %cst_68 = arith.constant dense<0.000000e+00> : vector<2x128xf32>
    %241 = tpu.matmul %240, %162, %cst_68 {dimension_numbers = #tpu.dot_dimension_numbers<[1], [0], [0], [1], [0, 0, 1, 1], [], []>} : vector<2x32xf32>, vector<32x128xf32>, vector<2x128xf32> -> vector<2x128xf32>
    %242 = arith.addf %176, %241 : vector<2x128xf32>
    %243 = math.tanh %242 : vector<2x128xf32>
    %244 = arith.mulf %243, %2 : vector<2x128xf32>
    %245 = arith.addf %244, %5 : vector<2x128xf32>
    %246 = vector.extract_strided_slice %245 {offsets = [0, 0], sizes = [2, 32], strides = [1, 1]} : vector<2x128xf32> to vector<2x32xf32>
    %247 = vector.extract_strided_slice %245 {offsets = [0, 32], sizes = [2, 32], strides = [1, 1]} : vector<2x128xf32> to vector<2x32xf32>
    %248 = vector.extract_strided_slice %245 {offsets = [0, 64], sizes = [2, 32], strides = [1, 1]} : vector<2x128xf32> to vector<2x32xf32>
    %249 = vector.extract_strided_slice %245 {offsets = [0, 96], sizes = [2, 32], strides = [1, 1]} : vector<2x128xf32> to vector<2x32xf32>
    %250 = arith.mulf %247, %238 : vector<2x32xf32>
    %251 = arith.mulf %246, %248 : vector<2x32xf32>
    %252 = arith.addf %250, %251 : vector<2x32xf32>
    %253 = math.tanh %252 : vector<2x32xf32>
    %254 = arith.mulf %249, %253 : vector<2x32xf32>
    %cst_69 = arith.constant dense<0.000000e+00> : vector<2x128xf32>
    %255 = tpu.matmul %254, %162, %cst_69 {dimension_numbers = #tpu.dot_dimension_numbers<[1], [0], [0], [1], [0, 0, 1, 1], [], []>} : vector<2x32xf32>, vector<32x128xf32>, vector<2x128xf32> -> vector<2x128xf32>
    %256 = arith.addf %178, %255 : vector<2x128xf32>
    %257 = math.tanh %256 : vector<2x128xf32>
    %258 = arith.mulf %257, %2 : vector<2x128xf32>
    %259 = arith.addf %258, %5 : vector<2x128xf32>
    %260 = vector.extract_strided_slice %259 {offsets = [0, 0], sizes = [2, 32], strides = [1, 1]} : vector<2x128xf32> to vector<2x32xf32>
    %261 = vector.extract_strided_slice %259 {offsets = [0, 32], sizes = [2, 32], strides = [1, 1]} : vector<2x128xf32> to vector<2x32xf32>
    %262 = vector.extract_strided_slice %259 {offsets = [0, 64], sizes = [2, 32], strides = [1, 1]} : vector<2x128xf32> to vector<2x32xf32>
    %263 = vector.extract_strided_slice %259 {offsets = [0, 96], sizes = [2, 32], strides = [1, 1]} : vector<2x128xf32> to vector<2x32xf32>
    %264 = arith.mulf %261, %252 : vector<2x32xf32>
    %265 = arith.mulf %260, %262 : vector<2x32xf32>
    %266 = arith.addf %264, %265 : vector<2x32xf32>
    %267 = math.tanh %266 : vector<2x32xf32>
    %268 = arith.mulf %263, %267 : vector<2x32xf32>
    %cst_70 = arith.constant dense<0.000000e+00> : vector<2x128xf32>
    %269 = tpu.matmul %268, %162, %cst_70 {dimension_numbers = #tpu.dot_dimension_numbers<[1], [0], [0], [1], [0, 0, 1, 1], [], []>} : vector<2x32xf32>, vector<32x128xf32>, vector<2x128xf32> -> vector<2x128xf32>
    %270 = arith.addf %180, %269 : vector<2x128xf32>
    %271 = math.tanh %270 : vector<2x128xf32>
    %272 = arith.mulf %271, %2 : vector<2x128xf32>
    %273 = arith.addf %272, %5 : vector<2x128xf32>
    %274 = vector.extract_strided_slice %273 {offsets = [0, 0], sizes = [2, 32], strides = [1, 1]} : vector<2x128xf32> to vector<2x32xf32>
    %275 = vector.extract_strided_slice %273 {offsets = [0, 32], sizes = [2, 32], strides = [1, 1]} : vector<2x128xf32> to vector<2x32xf32>
    %276 = vector.extract_strided_slice %273 {offsets = [0, 64], sizes = [2, 32], strides = [1, 1]} : vector<2x128xf32> to vector<2x32xf32>
    %277 = vector.extract_strided_slice %273 {offsets = [0, 96], sizes = [2, 32], strides = [1, 1]} : vector<2x128xf32> to vector<2x32xf32>
    %278 = arith.mulf %275, %266 : vector<2x32xf32>
    %279 = arith.mulf %274, %276 : vector<2x32xf32>
    %280 = arith.addf %278, %279 : vector<2x32xf32>
    %281 = math.tanh %280 : vector<2x32xf32>
    %282 = arith.mulf %277, %281 : vector<2x32xf32>
    %cst_71 = arith.constant dense<0.000000e+00> : vector<2x128xf32>
    %283 = tpu.matmul %282, %162, %cst_71 {dimension_numbers = #tpu.dot_dimension_numbers<[1], [0], [0], [1], [0, 0, 1, 1], [], []>} : vector<2x32xf32>, vector<32x128xf32>, vector<2x128xf32> -> vector<2x128xf32>
    %284 = arith.addf %182, %283 : vector<2x128xf32>
    %285 = math.tanh %284 : vector<2x128xf32>
    %286 = arith.mulf %285, %2 : vector<2x128xf32>
    %287 = arith.addf %286, %5 : vector<2x128xf32>
    %288 = vector.extract_strided_slice %287 {offsets = [0, 0], sizes = [2, 32], strides = [1, 1]} : vector<2x128xf32> to vector<2x32xf32>
    %289 = vector.extract_strided_slice %287 {offsets = [0, 32], sizes = [2, 32], strides = [1, 1]} : vector<2x128xf32> to vector<2x32xf32>
    %290 = vector.extract_strided_slice %287 {offsets = [0, 64], sizes = [2, 32], strides = [1, 1]} : vector<2x128xf32> to vector<2x32xf32>
    %291 = vector.extract_strided_slice %287 {offsets = [0, 96], sizes = [2, 32], strides = [1, 1]} : vector<2x128xf32> to vector<2x32xf32>
    %292 = arith.mulf %289, %280 : vector<2x32xf32>
    %293 = arith.mulf %288, %290 : vector<2x32xf32>
    %294 = arith.addf %292, %293 : vector<2x32xf32>
    %295 = math.tanh %294 : vector<2x32xf32>
    %296 = arith.mulf %291, %295 : vector<2x32xf32>
    %c1_72 = arith.constant 1 : index
    %c0_73 = arith.constant 0 : index
    %c0_74 = arith.constant 0 : index
    %297 = vector.load %arg2[%c1_72, %c0_73, %c0_74] : memref<3x32x128xf32, #tpu.memory_space<vmem>>, vector<1x32x128xf32>
    %298 = vector.shape_cast %297 : vector<1x32x128xf32> to vector<32x128xf32>
    %c2_75 = arith.constant 2 : index
    %c0_76 = arith.constant 0 : index
    %c0_77 = arith.constant 0 : index
    %299 = vector.load %arg3[%c2_75, %c0_76, %c0_77] : memref<4x32x128xf32, #tpu.memory_space<vmem>>, vector<1x32x128xf32>
    %300 = vector.shape_cast %299 : vector<1x32x128xf32> to vector<32x128xf32>
    %c2_78 = arith.constant 2 : index
    %c0_79 = arith.constant 0 : index
    %c0_80 = arith.constant 0 : index
    %301 = vector.load %arg4[%c2_78, %c0_79, %c0_80] : memref<4x1x128xf32, #tpu.memory_space<vmem>>, vector<1x1x128xf32>
    %302 = vector.shape_cast %301 : vector<1x1x128xf32> to vector<1x128xf32>
    %303 = vector.shape_cast %302 : vector<1x128xf32> to vector<1x128xf32>
    %304 = vector.broadcast %303 : vector<1x128xf32> to vector<2x128xf32>
    %cst_81 = arith.constant dense<0.000000e+00> : vector<2x128xf32>
    %305 = tpu.matmul %198, %298, %cst_81 {dimension_numbers = #tpu.dot_dimension_numbers<[1], [0], [0], [1], [0, 0, 1, 1], [], []>} : vector<2x32xf32>, vector<32x128xf32>, vector<2x128xf32> -> vector<2x128xf32>
    %306 = arith.addf %305, %304 : vector<2x128xf32>
    %cst_82 = arith.constant dense<0.000000e+00> : vector<2x128xf32>
    %307 = tpu.matmul %212, %298, %cst_82 {dimension_numbers = #tpu.dot_dimension_numbers<[1], [0], [0], [1], [0, 0, 1, 1], [], []>} : vector<2x32xf32>, vector<32x128xf32>, vector<2x128xf32> -> vector<2x128xf32>
    %308 = arith.addf %307, %304 : vector<2x128xf32>
    %cst_83 = arith.constant dense<0.000000e+00> : vector<2x128xf32>
    %309 = tpu.matmul %226, %298, %cst_83 {dimension_numbers = #tpu.dot_dimension_numbers<[1], [0], [0], [1], [0, 0, 1, 1], [], []>} : vector<2x32xf32>, vector<32x128xf32>, vector<2x128xf32> -> vector<2x128xf32>
    %310 = arith.addf %309, %304 : vector<2x128xf32>
    %cst_84 = arith.constant dense<0.000000e+00> : vector<2x128xf32>
    %311 = tpu.matmul %240, %298, %cst_84 {dimension_numbers = #tpu.dot_dimension_numbers<[1], [0], [0], [1], [0, 0, 1, 1], [], []>} : vector<2x32xf32>, vector<32x128xf32>, vector<2x128xf32> -> vector<2x128xf32>
    %312 = arith.addf %311, %304 : vector<2x128xf32>
    %cst_85 = arith.constant dense<0.000000e+00> : vector<2x128xf32>
    %313 = tpu.matmul %254, %298, %cst_85 {dimension_numbers = #tpu.dot_dimension_numbers<[1], [0], [0], [1], [0, 0, 1, 1], [], []>} : vector<2x32xf32>, vector<32x128xf32>, vector<2x128xf32> -> vector<2x128xf32>
    %314 = arith.addf %313, %304 : vector<2x128xf32>
    %cst_86 = arith.constant dense<0.000000e+00> : vector<2x128xf32>
    %315 = tpu.matmul %268, %298, %cst_86 {dimension_numbers = #tpu.dot_dimension_numbers<[1], [0], [0], [1], [0, 0, 1, 1], [], []>} : vector<2x32xf32>, vector<32x128xf32>, vector<2x128xf32> -> vector<2x128xf32>
    %316 = arith.addf %315, %304 : vector<2x128xf32>
    %cst_87 = arith.constant dense<0.000000e+00> : vector<2x128xf32>
    %317 = tpu.matmul %282, %298, %cst_87 {dimension_numbers = #tpu.dot_dimension_numbers<[1], [0], [0], [1], [0, 0, 1, 1], [], []>} : vector<2x32xf32>, vector<32x128xf32>, vector<2x128xf32> -> vector<2x128xf32>
    %318 = arith.addf %317, %304 : vector<2x128xf32>
    %cst_88 = arith.constant dense<0.000000e+00> : vector<2x128xf32>
    %319 = tpu.matmul %296, %298, %cst_88 {dimension_numbers = #tpu.dot_dimension_numbers<[1], [0], [0], [1], [0, 0, 1, 1], [], []>} : vector<2x32xf32>, vector<32x128xf32>, vector<2x128xf32> -> vector<2x128xf32>
    %320 = arith.addf %319, %304 : vector<2x128xf32>
    %cst_89 = arith.constant 0.000000e+00 : f32
    %321 = vector.broadcast %cst_89 : f32 to vector<2x32xf32>
    %cst_90 = arith.constant 0.000000e+00 : f32
    %322 = vector.broadcast %cst_90 : f32 to vector<2x32xf32>
    %cst_91 = arith.constant dense<0.000000e+00> : vector<2x128xf32>
    %323 = tpu.matmul %321, %300, %cst_91 {dimension_numbers = #tpu.dot_dimension_numbers<[1], [0], [0], [1], [0, 0, 1, 1], [], []>} : vector<2x32xf32>, vector<32x128xf32>, vector<2x128xf32> -> vector<2x128xf32>
    %324 = arith.addf %306, %323 : vector<2x128xf32>
    %325 = math.tanh %324 : vector<2x128xf32>
    %326 = arith.mulf %325, %2 : vector<2x128xf32>
    %327 = arith.addf %326, %5 : vector<2x128xf32>
    %328 = vector.extract_strided_slice %327 {offsets = [0, 0], sizes = [2, 32], strides = [1, 1]} : vector<2x128xf32> to vector<2x32xf32>
    %329 = vector.extract_strided_slice %327 {offsets = [0, 32], sizes = [2, 32], strides = [1, 1]} : vector<2x128xf32> to vector<2x32xf32>
    %330 = vector.extract_strided_slice %327 {offsets = [0, 64], sizes = [2, 32], strides = [1, 1]} : vector<2x128xf32> to vector<2x32xf32>
    %331 = vector.extract_strided_slice %327 {offsets = [0, 96], sizes = [2, 32], strides = [1, 1]} : vector<2x128xf32> to vector<2x32xf32>
    %332 = arith.mulf %329, %322 : vector<2x32xf32>
    %333 = arith.mulf %328, %330 : vector<2x32xf32>
    %334 = arith.addf %332, %333 : vector<2x32xf32>
    %335 = math.tanh %334 : vector<2x32xf32>
    %336 = arith.mulf %331, %335 : vector<2x32xf32>
    %cst_92 = arith.constant dense<0.000000e+00> : vector<2x128xf32>
    %337 = tpu.matmul %336, %300, %cst_92 {dimension_numbers = #tpu.dot_dimension_numbers<[1], [0], [0], [1], [0, 0, 1, 1], [], []>} : vector<2x32xf32>, vector<32x128xf32>, vector<2x128xf32> -> vector<2x128xf32>
    %338 = arith.addf %308, %337 : vector<2x128xf32>
    %339 = math.tanh %338 : vector<2x128xf32>
    %340 = arith.mulf %339, %2 : vector<2x128xf32>
    %341 = arith.addf %340, %5 : vector<2x128xf32>
    %342 = vector.extract_strided_slice %341 {offsets = [0, 0], sizes = [2, 32], strides = [1, 1]} : vector<2x128xf32> to vector<2x32xf32>
    %343 = vector.extract_strided_slice %341 {offsets = [0, 32], sizes = [2, 32], strides = [1, 1]} : vector<2x128xf32> to vector<2x32xf32>
    %344 = vector.extract_strided_slice %341 {offsets = [0, 64], sizes = [2, 32], strides = [1, 1]} : vector<2x128xf32> to vector<2x32xf32>
    %345 = vector.extract_strided_slice %341 {offsets = [0, 96], sizes = [2, 32], strides = [1, 1]} : vector<2x128xf32> to vector<2x32xf32>
    %346 = arith.mulf %343, %334 : vector<2x32xf32>
    %347 = arith.mulf %342, %344 : vector<2x32xf32>
    %348 = arith.addf %346, %347 : vector<2x32xf32>
    %349 = math.tanh %348 : vector<2x32xf32>
    %350 = arith.mulf %345, %349 : vector<2x32xf32>
    %cst_93 = arith.constant dense<0.000000e+00> : vector<2x128xf32>
    %351 = tpu.matmul %350, %300, %cst_93 {dimension_numbers = #tpu.dot_dimension_numbers<[1], [0], [0], [1], [0, 0, 1, 1], [], []>} : vector<2x32xf32>, vector<32x128xf32>, vector<2x128xf32> -> vector<2x128xf32>
    %352 = arith.addf %310, %351 : vector<2x128xf32>
    %353 = math.tanh %352 : vector<2x128xf32>
    %354 = arith.mulf %353, %2 : vector<2x128xf32>
    %355 = arith.addf %354, %5 : vector<2x128xf32>
    %356 = vector.extract_strided_slice %355 {offsets = [0, 0], sizes = [2, 32], strides = [1, 1]} : vector<2x128xf32> to vector<2x32xf32>
    %357 = vector.extract_strided_slice %355 {offsets = [0, 32], sizes = [2, 32], strides = [1, 1]} : vector<2x128xf32> to vector<2x32xf32>
    %358 = vector.extract_strided_slice %355 {offsets = [0, 64], sizes = [2, 32], strides = [1, 1]} : vector<2x128xf32> to vector<2x32xf32>
    %359 = vector.extract_strided_slice %355 {offsets = [0, 96], sizes = [2, 32], strides = [1, 1]} : vector<2x128xf32> to vector<2x32xf32>
    %360 = arith.mulf %357, %348 : vector<2x32xf32>
    %361 = arith.mulf %356, %358 : vector<2x32xf32>
    %362 = arith.addf %360, %361 : vector<2x32xf32>
    %363 = math.tanh %362 : vector<2x32xf32>
    %364 = arith.mulf %359, %363 : vector<2x32xf32>
    %cst_94 = arith.constant dense<0.000000e+00> : vector<2x128xf32>
    %365 = tpu.matmul %364, %300, %cst_94 {dimension_numbers = #tpu.dot_dimension_numbers<[1], [0], [0], [1], [0, 0, 1, 1], [], []>} : vector<2x32xf32>, vector<32x128xf32>, vector<2x128xf32> -> vector<2x128xf32>
    %366 = arith.addf %312, %365 : vector<2x128xf32>
    %367 = math.tanh %366 : vector<2x128xf32>
    %368 = arith.mulf %367, %2 : vector<2x128xf32>
    %369 = arith.addf %368, %5 : vector<2x128xf32>
    %370 = vector.extract_strided_slice %369 {offsets = [0, 0], sizes = [2, 32], strides = [1, 1]} : vector<2x128xf32> to vector<2x32xf32>
    %371 = vector.extract_strided_slice %369 {offsets = [0, 32], sizes = [2, 32], strides = [1, 1]} : vector<2x128xf32> to vector<2x32xf32>
    %372 = vector.extract_strided_slice %369 {offsets = [0, 64], sizes = [2, 32], strides = [1, 1]} : vector<2x128xf32> to vector<2x32xf32>
    %373 = vector.extract_strided_slice %369 {offsets = [0, 96], sizes = [2, 32], strides = [1, 1]} : vector<2x128xf32> to vector<2x32xf32>
    %374 = arith.mulf %371, %362 : vector<2x32xf32>
    %375 = arith.mulf %370, %372 : vector<2x32xf32>
    %376 = arith.addf %374, %375 : vector<2x32xf32>
    %377 = math.tanh %376 : vector<2x32xf32>
    %378 = arith.mulf %373, %377 : vector<2x32xf32>
    %cst_95 = arith.constant dense<0.000000e+00> : vector<2x128xf32>
    %379 = tpu.matmul %378, %300, %cst_95 {dimension_numbers = #tpu.dot_dimension_numbers<[1], [0], [0], [1], [0, 0, 1, 1], [], []>} : vector<2x32xf32>, vector<32x128xf32>, vector<2x128xf32> -> vector<2x128xf32>
    %380 = arith.addf %314, %379 : vector<2x128xf32>
    %381 = math.tanh %380 : vector<2x128xf32>
    %382 = arith.mulf %381, %2 : vector<2x128xf32>
    %383 = arith.addf %382, %5 : vector<2x128xf32>
    %384 = vector.extract_strided_slice %383 {offsets = [0, 0], sizes = [2, 32], strides = [1, 1]} : vector<2x128xf32> to vector<2x32xf32>
    %385 = vector.extract_strided_slice %383 {offsets = [0, 32], sizes = [2, 32], strides = [1, 1]} : vector<2x128xf32> to vector<2x32xf32>
    %386 = vector.extract_strided_slice %383 {offsets = [0, 64], sizes = [2, 32], strides = [1, 1]} : vector<2x128xf32> to vector<2x32xf32>
    %387 = vector.extract_strided_slice %383 {offsets = [0, 96], sizes = [2, 32], strides = [1, 1]} : vector<2x128xf32> to vector<2x32xf32>
    %388 = arith.mulf %385, %376 : vector<2x32xf32>
    %389 = arith.mulf %384, %386 : vector<2x32xf32>
    %390 = arith.addf %388, %389 : vector<2x32xf32>
    %391 = math.tanh %390 : vector<2x32xf32>
    %392 = arith.mulf %387, %391 : vector<2x32xf32>
    %cst_96 = arith.constant dense<0.000000e+00> : vector<2x128xf32>
    %393 = tpu.matmul %392, %300, %cst_96 {dimension_numbers = #tpu.dot_dimension_numbers<[1], [0], [0], [1], [0, 0, 1, 1], [], []>} : vector<2x32xf32>, vector<32x128xf32>, vector<2x128xf32> -> vector<2x128xf32>
    %394 = arith.addf %316, %393 : vector<2x128xf32>
    %395 = math.tanh %394 : vector<2x128xf32>
    %396 = arith.mulf %395, %2 : vector<2x128xf32>
    %397 = arith.addf %396, %5 : vector<2x128xf32>
    %398 = vector.extract_strided_slice %397 {offsets = [0, 0], sizes = [2, 32], strides = [1, 1]} : vector<2x128xf32> to vector<2x32xf32>
    %399 = vector.extract_strided_slice %397 {offsets = [0, 32], sizes = [2, 32], strides = [1, 1]} : vector<2x128xf32> to vector<2x32xf32>
    %400 = vector.extract_strided_slice %397 {offsets = [0, 64], sizes = [2, 32], strides = [1, 1]} : vector<2x128xf32> to vector<2x32xf32>
    %401 = vector.extract_strided_slice %397 {offsets = [0, 96], sizes = [2, 32], strides = [1, 1]} : vector<2x128xf32> to vector<2x32xf32>
    %402 = arith.mulf %399, %390 : vector<2x32xf32>
    %403 = arith.mulf %398, %400 : vector<2x32xf32>
    %404 = arith.addf %402, %403 : vector<2x32xf32>
    %405 = math.tanh %404 : vector<2x32xf32>
    %406 = arith.mulf %401, %405 : vector<2x32xf32>
    %cst_97 = arith.constant dense<0.000000e+00> : vector<2x128xf32>
    %407 = tpu.matmul %406, %300, %cst_97 {dimension_numbers = #tpu.dot_dimension_numbers<[1], [0], [0], [1], [0, 0, 1, 1], [], []>} : vector<2x32xf32>, vector<32x128xf32>, vector<2x128xf32> -> vector<2x128xf32>
    %408 = arith.addf %318, %407 : vector<2x128xf32>
    %409 = math.tanh %408 : vector<2x128xf32>
    %410 = arith.mulf %409, %2 : vector<2x128xf32>
    %411 = arith.addf %410, %5 : vector<2x128xf32>
    %412 = vector.extract_strided_slice %411 {offsets = [0, 0], sizes = [2, 32], strides = [1, 1]} : vector<2x128xf32> to vector<2x32xf32>
    %413 = vector.extract_strided_slice %411 {offsets = [0, 32], sizes = [2, 32], strides = [1, 1]} : vector<2x128xf32> to vector<2x32xf32>
    %414 = vector.extract_strided_slice %411 {offsets = [0, 64], sizes = [2, 32], strides = [1, 1]} : vector<2x128xf32> to vector<2x32xf32>
    %415 = vector.extract_strided_slice %411 {offsets = [0, 96], sizes = [2, 32], strides = [1, 1]} : vector<2x128xf32> to vector<2x32xf32>
    %416 = arith.mulf %413, %404 : vector<2x32xf32>
    %417 = arith.mulf %412, %414 : vector<2x32xf32>
    %418 = arith.addf %416, %417 : vector<2x32xf32>
    %419 = math.tanh %418 : vector<2x32xf32>
    %420 = arith.mulf %415, %419 : vector<2x32xf32>
    %cst_98 = arith.constant dense<0.000000e+00> : vector<2x128xf32>
    %421 = tpu.matmul %420, %300, %cst_98 {dimension_numbers = #tpu.dot_dimension_numbers<[1], [0], [0], [1], [0, 0, 1, 1], [], []>} : vector<2x32xf32>, vector<32x128xf32>, vector<2x128xf32> -> vector<2x128xf32>
    %422 = arith.addf %320, %421 : vector<2x128xf32>
    %423 = math.tanh %422 : vector<2x128xf32>
    %424 = arith.mulf %423, %2 : vector<2x128xf32>
    %425 = arith.addf %424, %5 : vector<2x128xf32>
    %426 = vector.extract_strided_slice %425 {offsets = [0, 0], sizes = [2, 32], strides = [1, 1]} : vector<2x128xf32> to vector<2x32xf32>
    %427 = vector.extract_strided_slice %425 {offsets = [0, 32], sizes = [2, 32], strides = [1, 1]} : vector<2x128xf32> to vector<2x32xf32>
    %428 = vector.extract_strided_slice %425 {offsets = [0, 64], sizes = [2, 32], strides = [1, 1]} : vector<2x128xf32> to vector<2x32xf32>
    %429 = vector.extract_strided_slice %425 {offsets = [0, 96], sizes = [2, 32], strides = [1, 1]} : vector<2x128xf32> to vector<2x32xf32>
    %430 = arith.mulf %427, %418 : vector<2x32xf32>
    %431 = arith.mulf %426, %428 : vector<2x32xf32>
    %432 = arith.addf %430, %431 : vector<2x32xf32>
    %433 = math.tanh %432 : vector<2x32xf32>
    %434 = arith.mulf %429, %433 : vector<2x32xf32>
    %c2_99 = arith.constant 2 : index
    %c0_100 = arith.constant 0 : index
    %c0_101 = arith.constant 0 : index
    %435 = vector.load %arg2[%c2_99, %c0_100, %c0_101] : memref<3x32x128xf32, #tpu.memory_space<vmem>>, vector<1x32x128xf32>
    %436 = vector.shape_cast %435 : vector<1x32x128xf32> to vector<32x128xf32>
    %c3_102 = arith.constant 3 : index
    %c0_103 = arith.constant 0 : index
    %c0_104 = arith.constant 0 : index
    %437 = vector.load %arg3[%c3_102, %c0_103, %c0_104] : memref<4x32x128xf32, #tpu.memory_space<vmem>>, vector<1x32x128xf32>
    %438 = vector.shape_cast %437 : vector<1x32x128xf32> to vector<32x128xf32>
    %c3_105 = arith.constant 3 : index
    %c0_106 = arith.constant 0 : index
    %c0_107 = arith.constant 0 : index
    %439 = vector.load %arg4[%c3_105, %c0_106, %c0_107] : memref<4x1x128xf32, #tpu.memory_space<vmem>>, vector<1x1x128xf32>
    %440 = vector.shape_cast %439 : vector<1x1x128xf32> to vector<1x128xf32>
    %441 = vector.shape_cast %440 : vector<1x128xf32> to vector<1x128xf32>
    %442 = vector.broadcast %441 : vector<1x128xf32> to vector<2x128xf32>
    %cst_108 = arith.constant dense<0.000000e+00> : vector<2x128xf32>
    %443 = tpu.matmul %336, %436, %cst_108 {dimension_numbers = #tpu.dot_dimension_numbers<[1], [0], [0], [1], [0, 0, 1, 1], [], []>} : vector<2x32xf32>, vector<32x128xf32>, vector<2x128xf32> -> vector<2x128xf32>
    %444 = arith.addf %443, %442 : vector<2x128xf32>
    %cst_109 = arith.constant dense<0.000000e+00> : vector<2x128xf32>
    %445 = tpu.matmul %350, %436, %cst_109 {dimension_numbers = #tpu.dot_dimension_numbers<[1], [0], [0], [1], [0, 0, 1, 1], [], []>} : vector<2x32xf32>, vector<32x128xf32>, vector<2x128xf32> -> vector<2x128xf32>
    %446 = arith.addf %445, %442 : vector<2x128xf32>
    %cst_110 = arith.constant dense<0.000000e+00> : vector<2x128xf32>
    %447 = tpu.matmul %364, %436, %cst_110 {dimension_numbers = #tpu.dot_dimension_numbers<[1], [0], [0], [1], [0, 0, 1, 1], [], []>} : vector<2x32xf32>, vector<32x128xf32>, vector<2x128xf32> -> vector<2x128xf32>
    %448 = arith.addf %447, %442 : vector<2x128xf32>
    %cst_111 = arith.constant dense<0.000000e+00> : vector<2x128xf32>
    %449 = tpu.matmul %378, %436, %cst_111 {dimension_numbers = #tpu.dot_dimension_numbers<[1], [0], [0], [1], [0, 0, 1, 1], [], []>} : vector<2x32xf32>, vector<32x128xf32>, vector<2x128xf32> -> vector<2x128xf32>
    %450 = arith.addf %449, %442 : vector<2x128xf32>
    %cst_112 = arith.constant dense<0.000000e+00> : vector<2x128xf32>
    %451 = tpu.matmul %392, %436, %cst_112 {dimension_numbers = #tpu.dot_dimension_numbers<[1], [0], [0], [1], [0, 0, 1, 1], [], []>} : vector<2x32xf32>, vector<32x128xf32>, vector<2x128xf32> -> vector<2x128xf32>
    %452 = arith.addf %451, %442 : vector<2x128xf32>
    %cst_113 = arith.constant dense<0.000000e+00> : vector<2x128xf32>
    %453 = tpu.matmul %406, %436, %cst_113 {dimension_numbers = #tpu.dot_dimension_numbers<[1], [0], [0], [1], [0, 0, 1, 1], [], []>} : vector<2x32xf32>, vector<32x128xf32>, vector<2x128xf32> -> vector<2x128xf32>
    %454 = arith.addf %453, %442 : vector<2x128xf32>
    %cst_114 = arith.constant dense<0.000000e+00> : vector<2x128xf32>
    %455 = tpu.matmul %420, %436, %cst_114 {dimension_numbers = #tpu.dot_dimension_numbers<[1], [0], [0], [1], [0, 0, 1, 1], [], []>} : vector<2x32xf32>, vector<32x128xf32>, vector<2x128xf32> -> vector<2x128xf32>
    %456 = arith.addf %455, %442 : vector<2x128xf32>
    %cst_115 = arith.constant dense<0.000000e+00> : vector<2x128xf32>
    %457 = tpu.matmul %434, %436, %cst_115 {dimension_numbers = #tpu.dot_dimension_numbers<[1], [0], [0], [1], [0, 0, 1, 1], [], []>} : vector<2x32xf32>, vector<32x128xf32>, vector<2x128xf32> -> vector<2x128xf32>
    %458 = arith.addf %457, %442 : vector<2x128xf32>
    %cst_116 = arith.constant 0.000000e+00 : f32
    %459 = vector.broadcast %cst_116 : f32 to vector<2x32xf32>
    %cst_117 = arith.constant 0.000000e+00 : f32
    %460 = vector.broadcast %cst_117 : f32 to vector<2x32xf32>
    %cst_118 = arith.constant dense<0.000000e+00> : vector<2x128xf32>
    %461 = tpu.matmul %459, %438, %cst_118 {dimension_numbers = #tpu.dot_dimension_numbers<[1], [0], [0], [1], [0, 0, 1, 1], [], []>} : vector<2x32xf32>, vector<32x128xf32>, vector<2x128xf32> -> vector<2x128xf32>
    %462 = arith.addf %444, %461 : vector<2x128xf32>
    %463 = math.tanh %462 : vector<2x128xf32>
    %464 = arith.mulf %463, %2 : vector<2x128xf32>
    %465 = arith.addf %464, %5 : vector<2x128xf32>
    %466 = vector.extract_strided_slice %465 {offsets = [0, 0], sizes = [2, 32], strides = [1, 1]} : vector<2x128xf32> to vector<2x32xf32>
    %467 = vector.extract_strided_slice %465 {offsets = [0, 32], sizes = [2, 32], strides = [1, 1]} : vector<2x128xf32> to vector<2x32xf32>
    %468 = vector.extract_strided_slice %465 {offsets = [0, 64], sizes = [2, 32], strides = [1, 1]} : vector<2x128xf32> to vector<2x32xf32>
    %469 = vector.extract_strided_slice %465 {offsets = [0, 96], sizes = [2, 32], strides = [1, 1]} : vector<2x128xf32> to vector<2x32xf32>
    %470 = arith.mulf %467, %460 : vector<2x32xf32>
    %471 = arith.mulf %466, %468 : vector<2x32xf32>
    %472 = arith.addf %470, %471 : vector<2x32xf32>
    %473 = math.tanh %472 : vector<2x32xf32>
    %474 = arith.mulf %469, %473 : vector<2x32xf32>
    %cst_119 = arith.constant dense<0.000000e+00> : vector<2x128xf32>
    %475 = tpu.matmul %474, %438, %cst_119 {dimension_numbers = #tpu.dot_dimension_numbers<[1], [0], [0], [1], [0, 0, 1, 1], [], []>} : vector<2x32xf32>, vector<32x128xf32>, vector<2x128xf32> -> vector<2x128xf32>
    %476 = arith.addf %446, %475 : vector<2x128xf32>
    %477 = math.tanh %476 : vector<2x128xf32>
    %478 = arith.mulf %477, %2 : vector<2x128xf32>
    %479 = arith.addf %478, %5 : vector<2x128xf32>
    %480 = vector.extract_strided_slice %479 {offsets = [0, 0], sizes = [2, 32], strides = [1, 1]} : vector<2x128xf32> to vector<2x32xf32>
    %481 = vector.extract_strided_slice %479 {offsets = [0, 32], sizes = [2, 32], strides = [1, 1]} : vector<2x128xf32> to vector<2x32xf32>
    %482 = vector.extract_strided_slice %479 {offsets = [0, 64], sizes = [2, 32], strides = [1, 1]} : vector<2x128xf32> to vector<2x32xf32>
    %483 = vector.extract_strided_slice %479 {offsets = [0, 96], sizes = [2, 32], strides = [1, 1]} : vector<2x128xf32> to vector<2x32xf32>
    %484 = arith.mulf %481, %472 : vector<2x32xf32>
    %485 = arith.mulf %480, %482 : vector<2x32xf32>
    %486 = arith.addf %484, %485 : vector<2x32xf32>
    %487 = math.tanh %486 : vector<2x32xf32>
    %488 = arith.mulf %483, %487 : vector<2x32xf32>
    %cst_120 = arith.constant dense<0.000000e+00> : vector<2x128xf32>
    %489 = tpu.matmul %488, %438, %cst_120 {dimension_numbers = #tpu.dot_dimension_numbers<[1], [0], [0], [1], [0, 0, 1, 1], [], []>} : vector<2x32xf32>, vector<32x128xf32>, vector<2x128xf32> -> vector<2x128xf32>
    %490 = arith.addf %448, %489 : vector<2x128xf32>
    %491 = math.tanh %490 : vector<2x128xf32>
    %492 = arith.mulf %491, %2 : vector<2x128xf32>
    %493 = arith.addf %492, %5 : vector<2x128xf32>
    %494 = vector.extract_strided_slice %493 {offsets = [0, 0], sizes = [2, 32], strides = [1, 1]} : vector<2x128xf32> to vector<2x32xf32>
    %495 = vector.extract_strided_slice %493 {offsets = [0, 32], sizes = [2, 32], strides = [1, 1]} : vector<2x128xf32> to vector<2x32xf32>
    %496 = vector.extract_strided_slice %493 {offsets = [0, 64], sizes = [2, 32], strides = [1, 1]} : vector<2x128xf32> to vector<2x32xf32>
    %497 = vector.extract_strided_slice %493 {offsets = [0, 96], sizes = [2, 32], strides = [1, 1]} : vector<2x128xf32> to vector<2x32xf32>
    %498 = arith.mulf %495, %486 : vector<2x32xf32>
    %499 = arith.mulf %494, %496 : vector<2x32xf32>
    %500 = arith.addf %498, %499 : vector<2x32xf32>
    %501 = math.tanh %500 : vector<2x32xf32>
    %502 = arith.mulf %497, %501 : vector<2x32xf32>
    %cst_121 = arith.constant dense<0.000000e+00> : vector<2x128xf32>
    %503 = tpu.matmul %502, %438, %cst_121 {dimension_numbers = #tpu.dot_dimension_numbers<[1], [0], [0], [1], [0, 0, 1, 1], [], []>} : vector<2x32xf32>, vector<32x128xf32>, vector<2x128xf32> -> vector<2x128xf32>
    %504 = arith.addf %450, %503 : vector<2x128xf32>
    %505 = math.tanh %504 : vector<2x128xf32>
    %506 = arith.mulf %505, %2 : vector<2x128xf32>
    %507 = arith.addf %506, %5 : vector<2x128xf32>
    %508 = vector.extract_strided_slice %507 {offsets = [0, 0], sizes = [2, 32], strides = [1, 1]} : vector<2x128xf32> to vector<2x32xf32>
    %509 = vector.extract_strided_slice %507 {offsets = [0, 32], sizes = [2, 32], strides = [1, 1]} : vector<2x128xf32> to vector<2x32xf32>
    %510 = vector.extract_strided_slice %507 {offsets = [0, 64], sizes = [2, 32], strides = [1, 1]} : vector<2x128xf32> to vector<2x32xf32>
    %511 = vector.extract_strided_slice %507 {offsets = [0, 96], sizes = [2, 32], strides = [1, 1]} : vector<2x128xf32> to vector<2x32xf32>
    %512 = arith.mulf %509, %500 : vector<2x32xf32>
    %513 = arith.mulf %508, %510 : vector<2x32xf32>
    %514 = arith.addf %512, %513 : vector<2x32xf32>
    %515 = math.tanh %514 : vector<2x32xf32>
    %516 = arith.mulf %511, %515 : vector<2x32xf32>
    %cst_122 = arith.constant dense<0.000000e+00> : vector<2x128xf32>
    %517 = tpu.matmul %516, %438, %cst_122 {dimension_numbers = #tpu.dot_dimension_numbers<[1], [0], [0], [1], [0, 0, 1, 1], [], []>} : vector<2x32xf32>, vector<32x128xf32>, vector<2x128xf32> -> vector<2x128xf32>
    %518 = arith.addf %452, %517 : vector<2x128xf32>
    %519 = math.tanh %518 : vector<2x128xf32>
    %520 = arith.mulf %519, %2 : vector<2x128xf32>
    %521 = arith.addf %520, %5 : vector<2x128xf32>
    %522 = vector.extract_strided_slice %521 {offsets = [0, 0], sizes = [2, 32], strides = [1, 1]} : vector<2x128xf32> to vector<2x32xf32>
    %523 = vector.extract_strided_slice %521 {offsets = [0, 32], sizes = [2, 32], strides = [1, 1]} : vector<2x128xf32> to vector<2x32xf32>
    %524 = vector.extract_strided_slice %521 {offsets = [0, 64], sizes = [2, 32], strides = [1, 1]} : vector<2x128xf32> to vector<2x32xf32>
    %525 = vector.extract_strided_slice %521 {offsets = [0, 96], sizes = [2, 32], strides = [1, 1]} : vector<2x128xf32> to vector<2x32xf32>
    %526 = arith.mulf %523, %514 : vector<2x32xf32>
    %527 = arith.mulf %522, %524 : vector<2x32xf32>
    %528 = arith.addf %526, %527 : vector<2x32xf32>
    %529 = math.tanh %528 : vector<2x32xf32>
    %530 = arith.mulf %525, %529 : vector<2x32xf32>
    %cst_123 = arith.constant dense<0.000000e+00> : vector<2x128xf32>
    %531 = tpu.matmul %530, %438, %cst_123 {dimension_numbers = #tpu.dot_dimension_numbers<[1], [0], [0], [1], [0, 0, 1, 1], [], []>} : vector<2x32xf32>, vector<32x128xf32>, vector<2x128xf32> -> vector<2x128xf32>
    %532 = arith.addf %454, %531 : vector<2x128xf32>
    %533 = math.tanh %532 : vector<2x128xf32>
    %534 = arith.mulf %533, %2 : vector<2x128xf32>
    %535 = arith.addf %534, %5 : vector<2x128xf32>
    %536 = vector.extract_strided_slice %535 {offsets = [0, 0], sizes = [2, 32], strides = [1, 1]} : vector<2x128xf32> to vector<2x32xf32>
    %537 = vector.extract_strided_slice %535 {offsets = [0, 32], sizes = [2, 32], strides = [1, 1]} : vector<2x128xf32> to vector<2x32xf32>
    %538 = vector.extract_strided_slice %535 {offsets = [0, 64], sizes = [2, 32], strides = [1, 1]} : vector<2x128xf32> to vector<2x32xf32>
    %539 = vector.extract_strided_slice %535 {offsets = [0, 96], sizes = [2, 32], strides = [1, 1]} : vector<2x128xf32> to vector<2x32xf32>
    %540 = arith.mulf %537, %528 : vector<2x32xf32>
    %541 = arith.mulf %536, %538 : vector<2x32xf32>
    %542 = arith.addf %540, %541 : vector<2x32xf32>
    %543 = math.tanh %542 : vector<2x32xf32>
    %544 = arith.mulf %539, %543 : vector<2x32xf32>
    %cst_124 = arith.constant dense<0.000000e+00> : vector<2x128xf32>
    %545 = tpu.matmul %544, %438, %cst_124 {dimension_numbers = #tpu.dot_dimension_numbers<[1], [0], [0], [1], [0, 0, 1, 1], [], []>} : vector<2x32xf32>, vector<32x128xf32>, vector<2x128xf32> -> vector<2x128xf32>
    %546 = arith.addf %456, %545 : vector<2x128xf32>
    %547 = math.tanh %546 : vector<2x128xf32>
    %548 = arith.mulf %547, %2 : vector<2x128xf32>
    %549 = arith.addf %548, %5 : vector<2x128xf32>
    %550 = vector.extract_strided_slice %549 {offsets = [0, 0], sizes = [2, 32], strides = [1, 1]} : vector<2x128xf32> to vector<2x32xf32>
    %551 = vector.extract_strided_slice %549 {offsets = [0, 32], sizes = [2, 32], strides = [1, 1]} : vector<2x128xf32> to vector<2x32xf32>
    %552 = vector.extract_strided_slice %549 {offsets = [0, 64], sizes = [2, 32], strides = [1, 1]} : vector<2x128xf32> to vector<2x32xf32>
    %553 = vector.extract_strided_slice %549 {offsets = [0, 96], sizes = [2, 32], strides = [1, 1]} : vector<2x128xf32> to vector<2x32xf32>
    %554 = arith.mulf %551, %542 : vector<2x32xf32>
    %555 = arith.mulf %550, %552 : vector<2x32xf32>
    %556 = arith.addf %554, %555 : vector<2x32xf32>
    %557 = math.tanh %556 : vector<2x32xf32>
    %558 = arith.mulf %553, %557 : vector<2x32xf32>
    %cst_125 = arith.constant dense<0.000000e+00> : vector<2x128xf32>
    %559 = tpu.matmul %558, %438, %cst_125 {dimension_numbers = #tpu.dot_dimension_numbers<[1], [0], [0], [1], [0, 0, 1, 1], [], []>} : vector<2x32xf32>, vector<32x128xf32>, vector<2x128xf32> -> vector<2x128xf32>
    %560 = arith.addf %458, %559 : vector<2x128xf32>
    %561 = math.tanh %560 : vector<2x128xf32>
    %562 = arith.mulf %561, %2 : vector<2x128xf32>
    %563 = arith.addf %562, %5 : vector<2x128xf32>
    %564 = vector.extract_strided_slice %563 {offsets = [0, 0], sizes = [2, 32], strides = [1, 1]} : vector<2x128xf32> to vector<2x32xf32>
    %565 = vector.extract_strided_slice %563 {offsets = [0, 32], sizes = [2, 32], strides = [1, 1]} : vector<2x128xf32> to vector<2x32xf32>
    %566 = vector.extract_strided_slice %563 {offsets = [0, 64], sizes = [2, 32], strides = [1, 1]} : vector<2x128xf32> to vector<2x32xf32>
    %567 = vector.extract_strided_slice %563 {offsets = [0, 96], sizes = [2, 32], strides = [1, 1]} : vector<2x128xf32> to vector<2x32xf32>
    %568 = arith.mulf %565, %556 : vector<2x32xf32>
    %569 = arith.mulf %564, %566 : vector<2x32xf32>
    %570 = arith.addf %568, %569 : vector<2x32xf32>
    %571 = math.tanh %570 : vector<2x32xf32>
    %572 = arith.mulf %567, %571 : vector<2x32xf32>
    %c0_126 = arith.constant 0 : index
    %c0_127 = arith.constant 0 : index
    %573 = vector.load %arg7[%c0_126, %c0_127] : memref<32x1xf32, #tpu.memory_space<vmem>>, vector<32x1xf32>
    %cst_128 = arith.constant dense<0.000000e+00> : vector<2x1xf32>
    %574 = tpu.matmul %572, %573, %cst_128 {dimension_numbers = #tpu.dot_dimension_numbers<[1], [0], [0], [1], [0, 0, 1, 1], [], []>} : vector<2x32xf32>, vector<32x1xf32>, vector<2x1xf32> -> vector<2x1xf32>
    %c0_129 = arith.constant 0 : index
    %c0_130 = arith.constant 0 : index
    %575 = vector.load %arg8[%c0_129, %c0_130] : memref<1x1xf32, #tpu.memory_space<vmem>>, vector<1x1xf32>
    %576 = vector.broadcast %575 : vector<1x1xf32> to vector<2x1xf32>
    %577 = arith.addf %574, %576 : vector<2x1xf32>
    %c0_131 = arith.constant 0 : index
    %c0_132 = arith.constant 0 : index
    %578 = vector.load %arg9[%c0_131, %c0_132] : memref<2x1xf32, #tpu.memory_space<vmem>>, vector<2x1xf32>
    tpu.vector_store %arg9[%c0_131, %c0_132], %577 {strides = array<i32>} : memref<2x1xf32, #tpu.memory_space<vmem>>, vector<2x1xf32>,
    return
  }
}

</mosaic_0001>

<bundles_post_ra>
// kernel: lstm_forward.1
= control target key start
LH: loop header
LB: loop body
LE: loop exit
PB: predicated region body
PF: predicated region fallthrough
CT: control target
= control target key end

     0   :  { %vm70_vm0 = vcmask 1043456   ;;  %vm66_vm1 = vcmask 31744   ;;  %v2528_v7 = vmov 0.0   ;;  %s2529_s28 = smov 64   ;;  %s2530_s29 = smov 32   ;;  %vm255_vm2 = vcmask 261120   ;;  %s3431_s1 = inlined_call_operand.vmem [shape: f32[4,128], index: 1, kind: input, shape index: {}]   ;;  %s3432_s0 = inlined_call_operand.vmem [shape: f32[8,2,4], index: 0, kind: input, shape index: {}]   ;;  %s3433_s3 = inlined_call_operand.vmem [shape: f32[4,32,128], index: 3, kind: input, shape index: {}]   ;;  %s3434_s4 = inlined_call_operand.vmem [shape: f32[4,1,128], index: 4, kind: input, shape index: {}]   ;;  %s3435_s5 = inlined_call_operand.vmem [shape: f32[1,128], index: 5, kind: input, shape index: {}]   ;;  %s3436_s6 = inlined_call_operand.vmem [shape: f32[1,128], index: 6, kind: input, shape index: {}]   ;;  %s3437_s2 = inlined_call_operand.vmem [shape: f32[3,32,128], index: 2, kind: input, shape index: {}]   ;;  %s3438_s7 = inlined_call_operand.vmem [shape: f32[32,1], index: 7, kind: input, shape index: {}]   ;;  %s3439_s8 = inlined_call_operand.<no memory space> [shape: f32[1,1], index: 8, kind: input, shape index: {}]   ;;  %s3440_s9 = inlined_call_operand.vmem [shape: f32[2,1], index: 9, kind: output, shape index: {}]  }
   0x1   :  { %v57_v0 = vld [vmem:[%s3431_s1] sm:$0xf]  ;;  %v2591_v2 = vld [vmem:[%s3433_s3 + $0x18] sm:$0xff]  ;;  %v2598_v3 = vld [vmem:[%s3433_s3 + $0x10] sm:$0xff]  ;;  %vm2283_vm3 = vcmask 1024  }
   0x2   :  { %v42_v1 = vld [vmem:[%s3432_s0] sm:$0x3]  ;;  %2296 = vmatpush.msk.msra.mxu0 %vm70_vm0, %v57_v0  ;;  %2298 = vmatpush.msk.msra.mxu1 %vm70_vm0, %v57_v0  ;;  %v2608_v4 = vld [vmem:[%s3433_s3 + $0x8] sm:$0xff]  ;;  %v2289_v25 = vld [vmem:[%s3432_s0 + $0x2] sm:$0x3] }
   0x3   :  { %2297 = vmatmul.msk.f32.vlgmr.msra.gmra.mxu0 %vm66_vm1, %v42_v1  ;;  %2300 = vmatpush.msk.msra.mxu2 %vm70_vm0, %v57_v0  ;;  %v2292_v5 = vld [vmem:[%s3432_s0 + $0x8] sm:$0x3]  ;;  %v2620_v6 = vld [vmem:[%s3433_s3] sm:$0xff]  ;;  %v2293_v26 = vld [vmem:[%s3432_s0 + $0xa] sm:$0x3] }
   0x4   :  { %2306 = vmatpush.msk.msrb.mxu1 %vm70_vm0, %v57_v0  ;;  %2304 = vmatpush.msk.msrb.mxu0 %vm70_vm0, %v57_v0  ;;  %v2634_v10 = vld [vmem:[%s3434_s4] ss:$0 sm:$0xff]  ;;  %v2290_v44 = vld [vmem:[%s3432_s0 + $0x4] sm:$0x3]  ;;  %v2294_v45 = vld [vmem:[%s3432_s0 + $0xc] sm:$0x3] }
   0x5   :  { %2308 = vmatpush.msk.msrb.mxu2 %vm70_vm0, %v57_v0  ;;  %2302 = vmatpush.msk.msra.mxu3 %vm70_vm0, %v57_v0  ;;  %v2640_v14 = vld [vmem:[%s3435_s5] ss:$0 sm:$0xff]  ;;  %v2291_v63 = vld [vmem:[%s3432_s0 + $0x6] sm:$0x3] }
   0x6   :  { %271 = vmatpush.msra.mxu0 %v2591_v2  ;;  %v2645_v15 = vld [vmem:[%s3436_s6] ss:$0 sm:$0xff]  ;;  %2299 = vmatmul.msk.f32.vlgmr.msra.gmra.mxu1 %vm66_vm1, %v2289_v25  ;;  %v2743_v25 = vld [vmem:[%s3437_s2 + $0x18] sm:$0xff] }
   0x7   :  { %2310 = vmatpush.msk.msrb.mxu3 %vm70_vm0, %v57_v0  ;;  %317 = vmatpush.msra.mxu1 %v2591_v2  ;;  %v2295_v0 = vld [vmem:[%s3432_s0 + $0xe] sm:$0x3] }
   0x8   :  { %272 = vmatpush.msra.mxu0 %v2598_v3  ;;  %2301 = vmatmul.msk.f32.vlgmr.msra.gmra.mxu2 %vm66_vm1, %v2290_v44  ;;  %v2797_v44 = vld [vmem:[%s3433_s3 + $0x38] sm:$0xff] }
   0x9   :  { %318 = vmatpush.msra.mxu1 %v2598_v3  ;;  %363 = vmatpush.msra.mxu2 %v2591_v2 }
   0xa   :  { %273 = vmatpush.msra.mxu0 %v2608_v4  ;;  %2303 = vmatmul.msk.f32.vlgmr.msra.gmra.mxu3 %vm66_vm1, %v2291_v63 }
   0xb   :  { %2305 = vmatmul.msk.f32.vlgmr.msrb.gmra.mxu0 %vm66_vm1, %v2292_v5  ;;  %319 = vmatpush.msra.mxu1 %v2608_v4 }
   0xc   :  { %274 = vmatpush.msra.mxu0 %v2620_v6  ;;  %364 = vmatpush.msra.mxu2 %v2598_v3 }
   0xd   :  { %320 = vmatpush.msra.mxu1 %v2620_v6  ;;  %409 = vmatpush.msra.mxu3 %v2591_v2 }
   0xe   :  { %455 = vmatpush.msrb.mxu0 %v2591_v2  ;;  %2307 = vmatmul.msk.f32.vlgmr.msrb.gmra.mxu1 %vm66_vm1, %v2293_v26  ;;  %v2748_v26 = vld [vmem:[%s3437_s2 + $0x10] sm:$0xff] }
   0xf   :  { %501 = vmatpush.msrb.mxu1 %v2591_v2  ;;  %365 = vmatpush.msra.mxu2 %v2608_v4 }
  0x10   :  { %456 = vmatpush.msrb.mxu0 %v2598_v3  ;;  %2309 = vmatmul.msk.f32.vlgmr.msrb.gmra.mxu2 %vm66_vm1, %v2294_v45  ;;  %v2802_v45 = vld [vmem:[%s3433_s3 + $0x30] sm:$0xff] }
  0x11   :  { %502 = vmatpush.msrb.mxu1 %v2598_v3  ;;  %366 = vmatpush.msra.mxu2 %v2620_v6 }
  0x12   :  { %457 = vmatpush.msrb.mxu0 %v2608_v4  ;;  %410 = vmatpush.msra.mxu3 %v2598_v3 }
  0x13   :  { %275 = vmatmul.f32.vlgmr.msra.gmra.mxu0 %v2528_v7  ;;  %503 = vmatpush.msrb.mxu1 %v2608_v4 }
  0x14   :  { %458 = vmatpush.msrb.mxu0 %v2620_v6  ;;  %547 = vmatpush.msrb.mxu2 %v2591_v2 }
  0x15   :  { %504 = vmatpush.msrb.mxu1 %v2620_v6  ;;  %411 = vmatpush.msra.mxu3 %v2608_v4 }
  0x16   :  { %548 = vmatpush.msrb.mxu2 %v2598_v3  ;;  %2311 = vmatmul.msk.f32.vlgmr.msrb.gmra.mxu3 %vm66_vm1, %v2295_v0 }
  0x17   :  { %412 = vmatpush.msra.mxu3 %v2620_v6  ;;  %648 = vmatpush.msra.mxu0 %v2743_v25 }
  0x18   :  { %549 = vmatpush.msrb.mxu2 %v2608_v4 }
  0x19   :  { %593 = vmatpush.msrb.mxu3 %v2591_v2  ;;  %649 = vmatpush.msra.mxu0 %v2748_v26 }
  0x1a   :  { %550 = vmatpush.msrb.mxu2 %v2620_v6 }
  0x1b   :  { %594 = vmatpush.msrb.mxu3 %v2598_v3 }
  0x1d   :  { %595 = vmatpush.msrb.mxu3 %v2608_v4 }
  0x1f   :  { %596 = vmatpush.msrb.mxu3 %v2620_v6 }
  0x80   :  { %v91_v8 = vpop.f32.mrf.mxu0 }
  0x81   :  { %v92_v11 = vadd.f32 %v2634_v10, %v91_v8 }
  0x83   :  { %v114_v30 = vpop.f32.mrf.mxu1 }
  0x84   :  { %v115_v32 = vadd.f32 %v2634_v10, %v114_v30 }
  0x88   :  { %v2629_v9 = vpop.f32.mrf.mxu0 }
  0x8b   :  { %v2673_v31 = vpop.f32.mrf.mxu1  ;;  %v137_v49 = vpop.f32.mrf.mxu2 }
  0x8c   :  { %v138_v51 = vadd.f32 %v2634_v10, %v137_v49 }
  0x90   :  { %v276_v12 = vpop.f32.mrf.mxu0 }
  0x91   :  { %v279_v13 = vadd.f32 %v276_v12, %v92_v11  ;;  %v160_v11 = vpop.f32.mrf.mxu3 }
  0x92   :  { %v161_v2 = vadd.f32 %v2634_v10, %v160_v11 }
  0x93   :  { %2398 = vtanh.f32 %v279_v13  ;;  %v2702_v50 = vpop.f32.mrf.mxu2 }
  0x99   :  { %v2399_v16 = vpop.eup %2398  ;;  %v2731_v12 = vpop.f32.mrf.mxu3 }
  0x9a   :  { %v281_v17 = vmul.f32 %v2399_v16, %v2640_v14 }
  0x9c   :  { %v282_v18 = vadd.f32 %v2645_v15, %v281_v17 }
  0x9e   :  { %285 = vrot.lane.b32.xlu0 %v282_v18, %s2529_s28  ;;  %v283_v21 = vmul.f32 0.0, %v282_v18 }
 0x110   :  { %v286_v19 = vpop.permute.xlu0 %285 }
 0x111   :  { %v288_v20 = vmul.f32 %v286_v19, %v282_v18 }
 0x113   :  { %290 = vrot.lane.b32.xlu0 %v288_v20, %s2530_s29 }
 0x185   :  { %v291_v22 = vpop.permute.xlu0 %290 }
 0x186   :  { %v293_v23 = vadd.f32 %v291_v22, %v283_v21 }
 0x188   :  { %2400 = vtanh.f32 %v293_v23 }
 0x18e   :  { %v2401_v24 = vpop.eup %2400 }
 0x18f   :  { %296 = vrot.lane.b32.xlu1 %v2401_v24, %s2529_s28 }
 0x201   :  { %v297_v27 = vpop.permute.xlu1 %296 }
 0x202   :  { %v299_v28 = vmul.f32 %v297_v27, %v282_v18  ;;  %v2755_v27 = vld [vmem:[%s3437_s2 + $0x8] sm:$0xff] }
 0x203   :  { %650 = vmatpush.msra.mxu0 %v2755_v27 }
 0x204   :  { %301 = vrot.lane.b32.xlu1 %v299_v28, %s2530_s29  ;;  %v2764_v28 = vld [vmem:[%s3437_s2] sm:$0xff] }
 0x205   :  { %651 = vmatpush.msra.mxu0 %v2764_v28 }
 0x276   :  { %v2669_v29 = vpop.permute.xlu1 %301 }
 0x277   :  { %2312 = vmatmul.msk.f32.vlgmr.msra.gmra.mxu1 %vm255_vm2, %v2669_v29 }
 0x278   :  { %668 = vmatpush.msra.mxu1 %v2743_v25 }
 0x27a   :  { %669 = vmatpush.msra.mxu1 %v2748_v26 }
 0x27c   :  { %670 = vmatpush.msra.mxu1 %v2755_v27 }
 0x27e   :  { %671 = vmatpush.msra.mxu1 %v2764_v28 }
 0x2f4   :  { %v322_v33 = vpop.f32.mrf.mxu1 }
 0x2f5   :  { %v325_v34 = vadd.f32 %v322_v33, %v115_v32  ;;  %v184_v32 = vadd.f32 %v2634_v10, %v2629_v9 }
 0x2f7   :  { %2402 = vtanh.f32 %v325_v34 }
 0x2fd   :  { %v2403_v35 = vpop.eup %2402 }
 0x2fe   :  { %v327_v36 = vmul.f32 %v2403_v35, %v2640_v14 }
 0x300   :  { %v328_v37 = vadd.f32 %v2645_v15, %v327_v36 }
 0x302   :  { %331 = vrot.lane.b32.xlu2 %v328_v37, %s2529_s28  ;;  %v329_v40 = vmul.f32 %v328_v37, %v293_v23 }
 0x35c   :  { %v332_v38 = vpop.permute.xlu2 %331 }
 0x35d   :  { %v334_v39 = vmul.f32 %v332_v38, %v328_v37 }
 0x35f   :  { %336 = vrot.lane.b32.xlu2 %v334_v39, %s2530_s29 }
 0x3b9   :  { %v337_v41 = vpop.permute.xlu2 %336 }
 0x3ba   :  { %v339_v42 = vadd.f32 %v337_v41, %v329_v40 }
 0x3bc   :  { %2404 = vtanh.f32 %v339_v42 }
 0x3c2   :  { %v2405_v43 = vpop.eup %2404 }
 0x3c3   :  { %342 = vrot.lane.b32.xlu0 %v2405_v43, %s2529_s28 }
 0x435   :  { %v343_v46 = vpop.permute.xlu0 %342 }
 0x436   :  { %v345_v47 = vmul.f32 %v343_v46, %v328_v37  ;;  %v2808_v46 = vld [vmem:[%s3433_s3 + $0x28] sm:$0xff] }
 0x438   :  { %347 = vrot.lane.b32.xlu1 %v345_v47, %s2530_s29  ;;  %v2814_v47 = vld [vmem:[%s3433_s3 + $0x20] sm:$0xff] }
 0x4aa   :  { %v2698_v48 = vpop.permute.xlu1 %347 }
 0x4ab   :  { %2313 = vmatmul.msk.f32.vlgmr.msra.gmra.mxu2 %vm255_vm2, %v2698_v48 }
 0x4ac   :  { %688 = vmatpush.msra.mxu2 %v2743_v25 }
 0x4ae   :  { %689 = vmatpush.msra.mxu2 %v2748_v26 }
 0x4b0   :  { %690 = vmatpush.msra.mxu2 %v2755_v27 }
 0x4b2   :  { %691 = vmatpush.msra.mxu2 %v2764_v28 }
 0x52e   :  { %v368_v52 = vpop.f32.mrf.mxu2 }
 0x52f   :  { %v371_v53 = vadd.f32 %v368_v52, %v138_v51  ;;  %v207_v52 = vadd.f32 %v2634_v10, %v2673_v31 }
 0x531   :  { %2406 = vtanh.f32 %v371_v53 }
 0x537   :  { %v2407_v54 = vpop.eup %2406 }
 0x538   :  { %v373_v55 = vmul.f32 %v2407_v54, %v2640_v14 }
 0x53a   :  { %v374_v56 = vadd.f32 %v2645_v15, %v373_v55 }
 0x53c   :  { %377 = vrot.lane.b32.xlu2 %v374_v56, %s2529_s28  ;;  %v375_v59 = vmul.f32 %v374_v56, %v339_v42 }
 0x596   :  { %v378_v57 = vpop.permute.xlu2 %377 }
 0x597   :  { %v380_v58 = vmul.f32 %v378_v57, %v374_v56 }
 0x599   :  { %382 = vrot.lane.b32.xlu0 %v380_v58, %s2530_s29 }
 0x60b   :  { %v383_v60 = vpop.permute.xlu0 %382 }
 0x60c   :  { %v385_v61 = vadd.f32 %v383_v60, %v375_v59 }
 0x60e   :  { %2408 = vtanh.f32 %v385_v61 }
 0x614   :  { %v2409_v62 = vpop.eup %2408 }
 0x615   :  { %388 = vrot.lane.b32.xlu1 %v2409_v62, %s2529_s28 }
 0x687   :  { %v389_v1 = vpop.permute.xlu1 %388 }
 0x688   :  { %v391_v5 = vmul.f32 %v389_v1, %v374_v56 }
 0x68a   :  { %393 = vrot.lane.b32.xlu2 %v391_v5, %s2530_s29 }
 0x6e4   :  { %v2727_v8 = vpop.permute.xlu2 %393 }
 0x6e5   :  { %2314 = vmatmul.msk.f32.vlgmr.msra.gmra.mxu3 %vm255_vm2, %v2727_v8 }
 0x6e6   :  { %708 = vmatpush.msra.mxu3 %v2743_v25 }
 0x6e8   :  { %709 = vmatpush.msra.mxu3 %v2748_v26 }
 0x6ea   :  { %710 = vmatpush.msra.mxu3 %v2755_v27 }
 0x6ec   :  { %711 = vmatpush.msra.mxu3 %v2764_v28 }
 0x768   :  { %v414_v13 = vpop.f32.mrf.mxu3 }
 0x769   :  { %v417_v3 = vadd.f32 %v414_v13, %v161_v2 }
 0x76b   :  { %2410 = vtanh.f32 %v417_v3 }
 0x771   :  { %v2411_v4 = vpop.eup %2410 }
 0x772   :  { %v419_v6 = vmul.f32 %v2411_v4, %v2640_v14 }
 0x774   :  { %v420_v16 = vadd.f32 %v2645_v15, %v419_v6 }
 0x776   :  { %423 = vrot.lane.b32.xlu0 %v420_v16, %s2529_s28  ;;  %v421_v19 = vmul.f32 %v420_v16, %v385_v61 }
 0x7e8   :  { %v424_v17 = vpop.permute.xlu0 %423 }
 0x7e9   :  { %v426_v18 = vmul.f32 %v424_v17, %v420_v16 }
 0x7eb   :  { %428 = vrot.lane.b32.xlu1 %v426_v18, %s2530_s29 }
 0x85d   :  { %v429_v20 = vpop.permute.xlu1 %428 }
 0x85e   :  { %v431_v21 = vadd.f32 %v429_v20, %v421_v19 }
 0x860   :  { %2412 = vtanh.f32 %v431_v21 }
 0x866   :  { %v2413_v22 = vpop.eup %2412 }
 0x867   :  { %434 = vrot.lane.b32.xlu2 %v2413_v22, %s2529_s28 }
 0x8c1   :  { %v435_v23 = vpop.permute.xlu2 %434 }
 0x8c2   :  { %v437_v24 = vmul.f32 %v435_v23, %v420_v16 }
 0x8c4   :  { %439 = vrot.lane.b32.xlu0 %v437_v24, %s2530_s29 }
 0x936   :  { %v2776_v30 = vpop.permute.xlu0 %439 }
 0x937   :  { %2315 = vmatmul.msk.f32.vlgmr.msrb.gmra.mxu0 %vm255_vm2, %v2776_v30 }
 0x938   :  { %728 = vmatpush.msrb.mxu0 %v2743_v25 }
 0x93a   :  { %729 = vmatpush.msrb.mxu0 %v2748_v26 }
 0x93c   :  { %730 = vmatpush.msrb.mxu0 %v2755_v27 }
 0x93e   :  { %731 = vmatpush.msrb.mxu0 %v2764_v28 }
 0x93f   :  { %2324 = vmatmul.msk.f32.vlgmr.msra.gmra.mxu0 %vm255_vm2, %v2669_v29 }
 0x940   :  { %813 = vmatpush.msra.mxu0 %v2797_v44 }
 0x942   :  { %814 = vmatpush.msra.mxu0 %v2802_v45 }
 0x944   :  { %815 = vmatpush.msra.mxu0 %v2808_v46 }
 0x946   :  { %816 = vmatpush.msra.mxu0 %v2814_v47 }
 0x9b4   :  { %v460_v33 = vpop.f32.mrf.mxu0 }
 0x9b5   :  { %v463_v34 = vadd.f32 %v460_v33, %v184_v32  ;;  %v230_v32 = vadd.f32 %v2634_v10, %v2702_v50 }
 0x9b7   :  { %2414 = vtanh.f32 %v463_v34 }
 0x9bc   :  { %v653_v51 = vpop.f32.mrf.mxu0 }
 0x9bd   :  { %v2415_v35 = vpop.eup %2414 }
 0x9be   :  { %v465_v36 = vmul.f32 %v2415_v35, %v2640_v14 }
 0x9c0   :  { %v466_v37 = vadd.f32 %v2645_v15, %v465_v36 }
 0x9c2   :  { %469 = vrot.lane.b32.xlu1 %v466_v37, %s2529_s28  ;;  %v467_v40 = vmul.f32 %v466_v37, %v431_v21 }
 0xa34   :  { %v470_v38 = vpop.permute.xlu1 %469 }
 0xa35   :  { %v472_v39 = vmul.f32 %v470_v38, %v466_v37 }
 0xa37   :  { %474 = vrot.lane.b32.xlu2 %v472_v39, %s2530_s29 }
 0xa91   :  { %v475_v41 = vpop.permute.xlu2 %474 }
 0xa92   :  { %v477_v29 = vadd.f32 %v475_v41, %v467_v40 }
 0xa94   :  { %2416 = vtanh.f32 %v477_v29 }
 0xa9a   :  { %v2417_v42 = vpop.eup %2416 }
 0xa9b   :  { %480 = vrot.lane.b32.xlu0 %v2417_v42, %s2529_s28 }
 0xb0d   :  { %v481_v9 = vpop.permute.xlu0 %480 }
 0xb0e   :  { %v483_v43 = vmul.f32 %v481_v9, %v466_v37 }
 0xb10   :  { %485 = vrot.lane.b32.xlu1 %v483_v43, %s2530_s29 }
 0xb82   :  { %v486_v49 = vpop.permute.xlu1 %485 }
 0xb83   :  { %2316 = vmatmul.msk.f32.vlgmr.msrb.gmra.mxu1 %vm255_vm2, %v486_v49  ;;  %2328 = vmatmul.msk.f32.vlgmr.msrb.gmra.mxu0 %vm255_vm2, %v486_v49 }
 0xb84   :  { %748 = vmatpush.msrb.mxu1 %v2743_v25  ;;  %997 = vmatpush.msrb.mxu0 %v2797_v44 }
 0xb86   :  { %749 = vmatpush.msrb.mxu1 %v2748_v26  ;;  %998 = vmatpush.msrb.mxu0 %v2802_v45 }
 0xb88   :  { %750 = vmatpush.msrb.mxu1 %v2755_v27  ;;  %999 = vmatpush.msrb.mxu0 %v2808_v46 }
 0xb8a   :  { %751 = vmatpush.msrb.mxu1 %v2764_v28  ;;  %1000 = vmatpush.msrb.mxu0 %v2814_v47 }
 0xb8b   :  { %2325 = vmatmul.msk.f32.vlgmr.msra.gmra.mxu1 %vm255_vm2, %v2698_v48  ;;  %817 = vmatmul.f32.vlgmr.msra.gmra.mxu0 %v2528_v7  ;;  %v2842_v48 = vld [vmem:[%s3434_s4 + $0x1] ss:$0 sm:$0xff] }
 0xb8c   :  { %859 = vmatpush.msra.mxu1 %v2797_v44  ;;  %v654_v56 = vadd.f32 %v2842_v48, %v653_v51 }
 0xb8e   :  { %860 = vmatpush.msra.mxu1 %v2802_v45 }
 0xb90   :  { %861 = vmatpush.msra.mxu1 %v2808_v46 }
 0xb92   :  { %862 = vmatpush.msra.mxu1 %v2814_v47 }
 0xc00   :  { %v506_v53 = vpop.f32.mrf.mxu1  ;;  %v2837_v54 = vpop.f32.mrf.mxu0 }
 0xc01   :  { %v509_v55 = vadd.f32 %v506_v53, %v207_v52 }
 0xc03   :  { %2418 = vtanh.f32 %v509_v55 }
 0xc08   :  { %v818_v57 = vpop.f32.mrf.mxu0  ;;  %v673_v35 = vpop.f32.mrf.mxu1 }
 0xc09   :  { %v2419_v58 = vpop.eup %2418  ;;  %v821_v59 = vadd.f32 %v818_v57, %v654_v56  ;;  %v674_v39 = vadd.f32 %v2842_v48, %v673_v35 }
 0xc0a   :  { %v511_v60 = vmul.f32 %v2419_v58, %v2640_v14 }
 0xc0b   :  { %2420 = vtanh.f32 %v821_v59 }
 0xc0c   :  { %v512_v31 = vadd.f32 %v2645_v15, %v511_v60 }
 0xc0e   :  { %515 = vrot.lane.b32.xlu2 %v512_v31, %s2529_s28  ;;  %v513_v2 = vmul.f32 %v512_v31, %v477_v29 }
 0xc11   :  { %v2421_v61 = vpop.eup %2420 }
 0xc12   :  { %v823_v62 = vmul.f32 %v2421_v61, %v2640_v14 }
 0xc14   :  { %v824_v63 = vadd.f32 %v2645_v15, %v823_v62 }
 0xc16   :  { %827 = vrot.lane.b32.xlu0 %v824_v63, %s2529_s28  ;;  %v825_v4 = vmul.f32 0.0, %v824_v63 }
 0xc68   :  { %v516_v0 = vpop.permute.xlu2 %515 }
 0xc69   :  { %v518_v1 = vmul.f32 %v516_v0, %v512_v31 }
 0xc6b   :  { %520 = vrot.lane.b32.xlu1 %v518_v1, %s2530_s29 }
 0xc88   :  { %v828_v5 = vpop.permute.xlu0 %827 }
 0xc89   :  { %v830_v11 = vmul.f32 %v828_v5, %v824_v63 }
 0xc8b   :  { %832 = vrot.lane.b32.xlu2 %v830_v11, %s2530_s29 }
 0xcdd   :  { %v521_v13 = vpop.permute.xlu1 %520 }
 0xcde   :  { %v523_v3 = vadd.f32 %v521_v13, %v513_v2 }
 0xce0   :  { %2422 = vtanh.f32 %v523_v3 }
 0xce5   :  { %v833_v6 = vpop.permute.xlu2 %832 }
 0xce6   :  { %v2423_v16 = vpop.eup %2422  ;;  %v835_v17 = vadd.f32 %v833_v6, %v825_v4 }
 0xce7   :  { %526 = vrot.lane.b32.xlu0 %v2423_v16, %s2529_s28 }
 0xce8   :  { %2424 = vtanh.f32 %v835_v17 }
 0xcee   :  { %v2425_v18 = vpop.eup %2424 }
 0xcef   :  { %838 = vrot.lane.b32.xlu1 %v2425_v18, %s2529_s28 }
 0xd59   :  { %v527_v19 = vpop.permute.xlu0 %526 }
 0xd5a   :  { %v529_v20 = vmul.f32 %v527_v19, %v512_v31 }
 0xd5c   :  { %531 = vrot.lane.b32.xlu2 %v529_v20, %s2530_s29 }
 0xd61   :  { %v839_v21 = vpop.permute.xlu1 %838 }
 0xd62   :  { %v841_v22 = vmul.f32 %v839_v21, %v824_v63 }
 0xd64   :  { %843 = vrot.lane.b32.xlu0 %v841_v22, %s2530_s29 }
 0xdb6   :  { %v532_v23 = vpop.permute.xlu2 %531 }
 0xdb7   :  { %2317 = vmatmul.msk.f32.vlgmr.msrb.gmra.mxu2 %vm255_vm2, %v532_v23  ;;  %2329 = vmatmul.msk.f32.vlgmr.msrb.gmra.mxu1 %vm255_vm2, %v532_v23 }
 0xdb8   :  { %768 = vmatpush.msrb.mxu2 %v2743_v25  ;;  %1043 = vmatpush.msrb.mxu1 %v2797_v44 }
 0xdba   :  { %769 = vmatpush.msrb.mxu2 %v2748_v26  ;;  %1044 = vmatpush.msrb.mxu1 %v2802_v45 }
 0xdbc   :  { %770 = vmatpush.msrb.mxu2 %v2755_v27  ;;  %1045 = vmatpush.msrb.mxu1 %v2808_v46 }
 0xdbe   :  { %771 = vmatpush.msrb.mxu2 %v2764_v28  ;;  %1046 = vmatpush.msrb.mxu1 %v2814_v47 }
 0xdbf   :  { %2326 = vmatmul.msk.f32.vlgmr.msra.gmra.mxu2 %vm255_vm2, %v2727_v8 }
 0xdc0   :  { %905 = vmatpush.msra.mxu2 %v2797_v44 }
 0xdc2   :  { %906 = vmatpush.msra.mxu2 %v2802_v45 }
 0xdc4   :  { %907 = vmatpush.msra.mxu2 %v2808_v46 }
 0xdc6   :  { %908 = vmatpush.msra.mxu2 %v2814_v47 }
 0xdd6   :  { %v2873_v24 = vpop.permute.xlu0 %843 }
 0xdd7   :  { %2332 = vmatmul.msk.f32.vlgmr.msra.gmra.mxu1 %vm255_vm2, %v2873_v24 }
 0xe34   :  { %v2882_v38 = vpop.f32.mrf.mxu1 }
 0xe3a   :  { %v552_v33 = vpop.f32.mrf.mxu2 }
 0xe3b   :  { %v555_v34 = vadd.f32 %v552_v33, %v230_v32 }
 0xe3d   :  { %2426 = vtanh.f32 %v555_v34 }
 0xe43   :  { %v2427_v8 = vpop.eup %2426 }
 0xe44   :  { %v557_v36 = vmul.f32 %v2427_v8, %v2640_v14 }
 0xe46   :  { %v558_v37 = vadd.f32 %v2645_v15, %v557_v36 }
 0xe48   :  { %561 = vrot.lane.b32.xlu1 %v558_v37, %s2529_s28  ;;  %v559_v52 = vmul.f32 %v558_v37, %v523_v3 }
 0xe54   :  { %v864_v40 = vpop.f32.mrf.mxu1 }
 0xe55   :  { %v867_v41 = vadd.f32 %v864_v40, %v674_v39 }
 0xe57   :  { %2428 = vtanh.f32 %v867_v41 }
 0xe5d   :  { %v2429_v29 = vpop.eup %2428 }
 0xe5e   :  { %v869_v50 = vmul.f32 %v2429_v29, %v2640_v14 }
 0xe60   :  { %v870_v42 = vadd.f32 %v2645_v15, %v869_v50 }
 0xe62   :  { %873 = vrot.lane.b32.xlu2 %v870_v42, %s2529_s28  ;;  %v871_v56 = vmul.f32 %v870_v42, %v835_v17 }
 0xeba   :  { %v562_v9 = vpop.permute.xlu1 %561 }
 0xebb   :  { %v564_v43 = vmul.f32 %v562_v9, %v558_v37 }
 0xebc   :  { %v874_v49 = vpop.permute.xlu2 %873 }
 0xebd   :  { %v876_v51 = vmul.f32 %v874_v49, %v870_v42  ;;  %566 = vrot.lane.b32.xlu0 %v564_v43, %s2530_s29 }
 0xebf   :  { %878 = vrot.lane.b32.xlu1 %v876_v51, %s2530_s29 }
 0xf2f   :  { %v567_v53 = vpop.permute.xlu0 %566 }
 0xf30   :  { %v569_v55 = vadd.f32 %v567_v53, %v559_v52 }
 0xf31   :  { %v879_v57 = vpop.permute.xlu1 %878 }
 0xf32   :  { %2430 = vtanh.f32 %v569_v55  ;;  %v881_v58 = vadd.f32 %v879_v57, %v871_v56 }
 0xf34   :  { %2432 = vtanh.f32 %v881_v58 }
 0xf38   :  { %v2431_v59 = vpop.eup %2430 }
 0xf39   :  { %572 = vrot.lane.b32.xlu2 %v2431_v59, %s2529_s28  ;;  %v2957_v59 = vld [vmem:[%s3437_s2 + $0x30] sm:$0xff] }
 0xf3a   :  { %v2433_v60 = vpop.eup %2432 }
 0xf3b   :  { %884 = vrot.lane.b32.xlu0 %v2433_v60, %s2529_s28  ;;  %v2964_v60 = vld [vmem:[%s3437_s2 + $0x28] sm:$0xff] }
 0xf93   :  { %v573_v31 = vpop.permute.xlu2 %572 }
 0xf94   :  { %v575_v61 = vmul.f32 %v573_v31, %v558_v37  ;;  %v2973_v31 = vld [vmem:[%s3437_s2 + $0x20] sm:$0xff] }
 0xf96   :  { %577 = vrot.lane.b32.xlu1 %v575_v61, %s2530_s29 }
 0xfad   :  { %v885_v62 = vpop.permute.xlu0 %884 }
 0xfae   :  { %v887_v63 = vmul.f32 %v885_v62, %v870_v42  ;;  %v734_v62 = vadd.f32 %v2842_v48, %v2837_v54 }
 0xfb0   :  { %889 = vrot.lane.b32.xlu2 %v887_v63, %s2530_s29 }
0x1008   :  { %v578_v0 = vpop.permute.xlu1 %577 }
0x1009   :  { %2318 = vmatmul.msk.f32.vlgmr.msrb.gmra.mxu3 %vm255_vm2, %v578_v0  ;;  %2330 = vmatmul.msk.f32.vlgmr.msrb.gmra.mxu2 %vm255_vm2, %v578_v0 }
0x100a   :  { %793 = vmatpush.msrb.mxu3 %v2743_v25  ;;  %1089 = vmatpush.msrb.mxu2 %v2797_v44  ;;  %v2902_v1 = vpop.permute.xlu2 %889  ;;  %v693_v25 = vpop.f32.mrf.mxu2 }
0x100c   :  { %794 = vmatpush.msrb.mxu3 %v2748_v26  ;;  %1090 = vmatpush.msrb.mxu2 %v2802_v45  ;;  %v253_v26 = vadd.f32 %v2634_v10, %v2731_v12 }
0x100e   :  { %795 = vmatpush.msrb.mxu3 %v2755_v27  ;;  %1091 = vmatpush.msrb.mxu2 %v2808_v46 }
0x1010   :  { %796 = vmatpush.msrb.mxu3 %v2764_v28  ;;  %1092 = vmatpush.msrb.mxu2 %v2814_v47 }
0x1011   :  { %2327 = vmatmul.msk.f32.vlgmr.msra.gmra.mxu3 %vm255_vm2, %v2776_v30  ;;  %2333 = vmatmul.msk.f32.vlgmr.msra.gmra.mxu2 %vm255_vm2, %v2902_v1  ;;  %v694_v30 = vadd.f32 %v2842_v48, %v693_v25 }
0x1012   :  { %951 = vmatpush.msra.mxu3 %v2797_v44 }
0x1014   :  { %952 = vmatpush.msra.mxu3 %v2802_v45 }
0x1016   :  { %953 = vmatpush.msra.mxu3 %v2808_v46 }
0x1018   :  { %954 = vmatpush.msra.mxu3 %v2814_v47 }
0x108c   :  { %v598_v27 = vpop.f32.mrf.mxu3  ;;  %v2916_v28 = vpop.f32.mrf.mxu2 }
0x108d   :  { %v601_v5 = vadd.f32 %v598_v27, %v253_v26 }
0x108f   :  { %2434 = vtanh.f32 %v601_v5 }
0x1094   :  { %v910_v11 = vpop.f32.mrf.mxu2  ;;  %v713_v29 = vpop.f32.mrf.mxu3 }
0x1095   :  { %v2435_v2 = vpop.eup %2434  ;;  %v913_v13 = vadd.f32 %v910_v11, %v694_v30  ;;  %v714_v42 = vadd.f32 %v2842_v48, %v713_v29 }
0x1096   :  { %v603_v3 = vmul.f32 %v2435_v2, %v2640_v14 }
0x1097   :  { %2436 = vtanh.f32 %v913_v13 }
0x1098   :  { %v604_v4 = vadd.f32 %v2645_v15, %v603_v3 }
0x109a   :  { %607 = vrot.lane.b32.xlu0 %v604_v4, %s2529_s28  ;;  %v605_v20 = vmul.f32 %v604_v4, %v569_v55 }
0x109d   :  { %v2437_v6 = vpop.eup %2436 }
0x109e   :  { %v915_v10 = vmul.f32 %v2437_v6, %v2640_v14  ;;  %v3014_v6 = vld [vmem:[%s3433_s3 + $0x50] sm:$0xff] }
0x10a0   :  { %v916_v12 = vadd.f32 %v2645_v15, %v915_v10  ;;  %v3020_v10 = vld [vmem:[%s3433_s3 + $0x48] sm:$0xff] }
0x10a2   :  { %919 = vrot.lane.b32.xlu1 %v916_v12, %s2529_s28  ;;  %v917_v32 = vmul.f32 %v916_v12, %v881_v58  ;;  %v2952_v58 = vld [vmem:[%s3437_s2 + $0x38] sm:$0xff] }
0x10a3   :  { %1191 = vmatpush.msra.mxu0 %v2952_v58  ;;  %1211 = vmatpush.msra.mxu1 %v2952_v58 }
0x10a4   :  { %1231 = vmatpush.msra.mxu2 %v2952_v58 }
0x10a5   :  { %1192 = vmatpush.msra.mxu0 %v2957_v59  ;;  %1212 = vmatpush.msra.mxu1 %v2957_v59 }
0x10a6   :  { %1232 = vmatpush.msra.mxu2 %v2957_v59 }
0x10a7   :  { %1193 = vmatpush.msra.mxu0 %v2964_v60  ;;  %1213 = vmatpush.msra.mxu1 %v2964_v60 }
0x10a8   :  { %1233 = vmatpush.msra.mxu2 %v2964_v60 }
0x10a9   :  { %1194 = vmatpush.msra.mxu0 %v2973_v31  ;;  %1214 = vmatpush.msra.mxu1 %v2973_v31 }
0x10aa   :  { %1234 = vmatpush.msra.mxu2 %v2973_v31 }
0x110c   :  { %v608_v16 = vpop.permute.xlu0 %607 }
0x110d   :  { %v610_v17 = vmul.f32 %v608_v16, %v604_v4 }
0x110f   :  { %612 = vrot.lane.b32.xlu2 %v610_v17, %s2530_s29 }
0x1114   :  { %v920_v18 = vpop.permute.xlu1 %919 }
0x1115   :  { %v922_v19 = vmul.f32 %v920_v18, %v916_v12  ;;  %v754_v18 = vadd.f32 %v2842_v48, %v2882_v38 }
0x1117   :  { %924 = vrot.lane.b32.xlu0 %v922_v19, %s2530_s29 }
0x1169   :  { %v613_v21 = vpop.permute.xlu2 %612 }
0x116a   :  { %v615_v22 = vadd.f32 %v613_v21, %v605_v20 }
0x116c   :  { %2438 = vtanh.f32 %v615_v22 }
0x1172   :  { %v2439_v23 = vpop.eup %2438 }
0x1173   :  { %618 = vrot.lane.b32.xlu1 %v2439_v23, %s2529_s28 }
0x1189   :  { %v925_v33 = vpop.permute.xlu0 %924 }
0x118a   :  { %v927_v34 = vadd.f32 %v925_v33, %v917_v32 }
0x118c   :  { %2440 = vtanh.f32 %v927_v34 }
0x1192   :  { %v2441_v8 = vpop.eup %2440 }
0x1193   :  { %930 = vrot.lane.b32.xlu2 %v2441_v8, %s2529_s28 }
0x11e5   :  { %v619_v35 = vpop.permute.xlu1 %618 }
0x11e6   :  { %v621_v36 = vmul.f32 %v619_v35, %v604_v4  ;;  %v3009_v4 = vld [vmem:[%s3433_s3 + $0x58] sm:$0xff] }
0x11e8   :  { %777 = vrot.lane.b32.xlu0 %v621_v36, %s2530_s29 }
0x11ed   :  { %v931_v37 = vpop.permute.xlu2 %930 }
0x11ee   :  { %v933_v39 = vmul.f32 %v931_v37, %v916_v12  ;;  %v3026_v12 = vld [vmem:[%s3433_s3 + $0x40] sm:$0xff] }
0x11f0   :  { %935 = vrot.lane.b32.xlu1 %v933_v39, %s2530_s29 }
0x125a   :  { %v778_v40 = vpop.permute.xlu0 %777 }
0x125b   :  { %2331 = vmatmul.msk.f32.vlgmr.msrb.gmra.mxu3 %vm255_vm2, %v778_v40 }
0x125c   :  { %1135 = vmatpush.msrb.mxu3 %v2797_v44 }
0x125e   :  { %1136 = vmatpush.msrb.mxu3 %v2802_v45 }
0x1260   :  { %1137 = vmatpush.msrb.mxu3 %v2808_v46 }
0x1262   :  { %v2935_v41 = vpop.permute.xlu1 %935  ;;  %1138 = vmatpush.msrb.mxu3 %v2814_v47 }
0x1263   :  { %2334 = vmatmul.msk.f32.vlgmr.msra.gmra.mxu3 %vm255_vm2, %v2935_v41 }
0x1264   :  { %1251 = vmatpush.msra.mxu3 %v2952_v58 }
0x1266   :  { %1252 = vmatpush.msra.mxu3 %v2957_v59 }
0x1268   :  { %1253 = vmatpush.msra.mxu3 %v2964_v60 }
0x126a   :  { %1254 = vmatpush.msra.mxu3 %v2973_v31 }
0x12de   :  { %v2940_v50 = vpop.f32.mrf.mxu3 }
0x12e6   :  { %v956_v9 = vpop.f32.mrf.mxu3 }
0x12e7   :  { %v959_v43 = vadd.f32 %v956_v9, %v714_v42 }
0x12e9   :  { %2442 = vtanh.f32 %v959_v43 }
0x12ef   :  { %v2443_v44 = vpop.eup %2442 }
0x12f0   :  { %v961_v45 = vmul.f32 %v2443_v44, %v2640_v14 }
0x12f2   :  { %v962_v46 = vadd.f32 %v2645_v15, %v961_v45 }
0x12f4   :  { %965 = vrot.lane.b32.xlu2 %v962_v46, %s2529_s28  ;;  %v963_v51 = vmul.f32 %v962_v46, %v927_v34 }
0x134e   :  { %v966_v49 = vpop.permute.xlu2 %965 }
0x134f   :  { %v968_v47 = vmul.f32 %v966_v49, %v962_v46 }
0x1351   :  { %970 = vrot.lane.b32.xlu0 %v968_v47, %s2530_s29 }
0x13c3   :  { %v971_v52 = vpop.permute.xlu0 %970 }
0x13c4   :  { %v973_v53 = vadd.f32 %v971_v52, %v963_v51 }
0x13c6   :  { %2444 = vtanh.f32 %v973_v53 }
0x13cc   :  { %v2445_v55 = vpop.eup %2444 }
0x13cd   :  { %976 = vrot.lane.b32.xlu1 %v2445_v55, %s2529_s28 }
0x143f   :  { %v977_v56 = vpop.permute.xlu1 %976 }
0x1440   :  { %v979_v57 = vmul.f32 %v977_v56, %v962_v46 }
0x1442   :  { %981 = vrot.lane.b32.xlu2 %v979_v57, %s2530_s29 }
0x149c   :  { %v2985_v61 = vpop.permute.xlu2 %981 }
0x149d   :  { %2335 = vmatmul.msk.f32.vlgmr.msrb.gmra.mxu0 %vm255_vm2, %v2985_v61 }
0x149e   :  { %1271 = vmatpush.msrb.mxu0 %v2952_v58 }
0x14a0   :  { %1272 = vmatpush.msrb.mxu0 %v2957_v59 }
0x14a2   :  { %1273 = vmatpush.msrb.mxu0 %v2964_v60 }
0x14a4   :  { %1274 = vmatpush.msrb.mxu0 %v2973_v31 }
0x14a5   :  { %2348 = vmatmul.msk.f32.vlgmr.msra.gmra.mxu0 %vm255_vm2, %v2873_v24 }
0x14a6   :  { %1356 = vmatpush.msra.mxu0 %v3009_v4 }
0x14a8   :  { %1357 = vmatpush.msra.mxu0 %v3014_v6 }
0x14aa   :  { %1358 = vmatpush.msra.mxu0 %v3020_v10 }
0x14ac   :  { %1359 = vmatpush.msra.mxu0 %v3026_v12 }
0x151a   :  { %v1002_v63 = vpop.f32.mrf.mxu0 }
0x151b   :  { %v1005_v0 = vadd.f32 %v1002_v63, %v734_v62  ;;  %v774_v62 = vadd.f32 %v2842_v48, %v2916_v28  ;;  %v3108_v28 = vld [vmem:[%s3436_s6] ss:$0 sm:$0xff] }
0x151d   :  { %2446 = vtanh.f32 %v1005_v0 }
0x1522   :  { %v1196_v17 = vpop.f32.mrf.mxu0 }
0x1523   :  { %v2447_v25 = vpop.eup %2446 }
0x1524   :  { %v1007_v26 = vmul.f32 %v2447_v25, %v2640_v14 }
0x1526   :  { %v1008_v27 = vadd.f32 %v2645_v15, %v1007_v26 }
0x1528   :  { %1011 = vrot.lane.b32.xlu0 %v1008_v27, %s2529_s28  ;;  %v1009_v11 = vmul.f32 %v1008_v27, %v973_v53 }
0x159a   :  { %v1012_v5 = vpop.permute.xlu0 %1011 }
0x159b   :  { %v1014_v30 = vmul.f32 %v1012_v5, %v1008_v27  ;;  %v3101_v5 = vld [vmem:[%s3435_s5] ss:$0 sm:$0xff] }
0x159d   :  { %1016 = vrot.lane.b32.xlu1 %v1014_v30, %s2530_s29 }
0x160f   :  { %v1017_v2 = vpop.permute.xlu1 %1016 }
0x1610   :  { %v3001_v24 = vadd.f32 %v1017_v2, %v1009_v11 }
0x1612   :  { %2448 = vtanh.f32 %v3001_v24 }
0x1618   :  { %v2449_v54 = vpop.eup %2448 }
0x1619   :  { %1022 = vrot.lane.b32.xlu2 %v2449_v54, %s2529_s28 }
0x1673   :  { %v1023_v13 = vpop.permute.xlu2 %1022 }
0x1674   :  { %v1025_v3 = vmul.f32 %v1023_v13, %v1008_v27 }
0x1676   :  { %1027 = vrot.lane.b32.xlu0 %v1025_v3, %s2530_s29 }
0x16e8   :  { %v1028_v16 = vpop.permute.xlu0 %1027 }
0x16e9   :  { %2336 = vmatmul.msk.f32.vlgmr.msrb.gmra.mxu1 %vm255_vm2, %v1028_v16  ;;  %2352 = vmatmul.msk.f32.vlgmr.msrb.gmra.mxu0 %vm255_vm2, %v1028_v16 }
0x16ea   :  { %1291 = vmatpush.msrb.mxu1 %v2952_v58  ;;  %1540 = vmatpush.msrb.mxu0 %v3009_v4 }
0x16ec   :  { %1292 = vmatpush.msrb.mxu1 %v2957_v59  ;;  %1541 = vmatpush.msrb.mxu0 %v3014_v6 }
0x16ee   :  { %1293 = vmatpush.msrb.mxu1 %v2964_v60  ;;  %1542 = vmatpush.msrb.mxu0 %v3020_v10 }
0x16f0   :  { %1294 = vmatpush.msrb.mxu1 %v2973_v31  ;;  %1543 = vmatpush.msrb.mxu0 %v3026_v12 }
0x16f1   :  { %2349 = vmatmul.msk.f32.vlgmr.msra.gmra.mxu1 %vm255_vm2, %v2902_v1  ;;  %1360 = vmatmul.f32.vlgmr.msra.gmra.mxu0 %v2528_v7  ;;  %v3054_v1 = vld [vmem:[%s3434_s4 + $0x2] ss:$0 sm:$0xff] }
0x16f2   :  { %1402 = vmatpush.msra.mxu1 %v3009_v4  ;;  %v1197_v22 = vadd.f32 %v3054_v1, %v1196_v17 }
0x16f4   :  { %1403 = vmatpush.msra.mxu1 %v3014_v6 }
0x16f6   :  { %1404 = vmatpush.msra.mxu1 %v3020_v10 }
0x16f8   :  { %1405 = vmatpush.msra.mxu1 %v3026_v12 }
0x1766   :  { %v1048_v19 = vpop.f32.mrf.mxu1  ;;  %v3049_v20 = vpop.f32.mrf.mxu0 }
0x1767   :  { %v1051_v21 = vadd.f32 %v1048_v19, %v754_v18 }
0x1769   :  { %2450 = vtanh.f32 %v1051_v21 }
0x176e   :  { %v1361_v23 = vpop.f32.mrf.mxu0  ;;  %v1216_v56 = vpop.f32.mrf.mxu1 }
0x176f   :  { %v2451_v32 = vpop.eup %2450  ;;  %v1364_v33 = vadd.f32 %v1361_v23, %v1197_v22 }
0x1770   :  { %v1053_v34 = vmul.f32 %v2451_v32, %v2640_v14 }
0x1771   :  { %2452 = vtanh.f32 %v1364_v33 }
0x1772   :  { %v1054_v38 = vadd.f32 %v2645_v15, %v1053_v34 }
0x1774   :  { %1057 = vrot.lane.b32.xlu1 %v1054_v38, %s2529_s28 }
0x1777   :  { %v2453_v8 = vpop.eup %2452 }
0x1778   :  { %v1366_v35 = vmul.f32 %v2453_v8, %v2640_v14  ;;  %v1055_v14 = vmul.f32 %v1054_v38, %v3001_v24 }
0x177a   :  { %v1367_v36 = vadd.f32 %v2645_v15, %v1366_v35 }
0x177c   :  { %1370 = vrot.lane.b32.xlu2 %v1367_v36, %s2529_s28  ;;  %v1368_v42 = vmul.f32 0.0, %v1367_v36 }
0x17d6   :  { %v1371_v37 = vpop.permute.xlu2 %1370 }
0x17d7   :  { %v1373_v39 = vmul.f32 %v1371_v37, %v1367_v36 }
0x17d9   :  { %1375 = vrot.lane.b32.xlu1 %v1373_v39, %s2530_s29 }
0x17e6   :  { %v1058_v40 = vpop.permute.xlu1 %1057 }
0x17e7   :  { %v1060_v29 = vmul.f32 %v1058_v40, %v1054_v38 }
0x17e9   :  { %1062 = vrot.lane.b32.xlu0 %v1060_v29, %s2530_s29 }
0x184b   :  { %v1376_v9 = vpop.permute.xlu1 %1375 }
0x184c   :  { %v3065_v43 = vadd.f32 %v1376_v9, %v1368_v42 }
0x184e   :  { %2454 = vtanh.f32 %v3065_v43 }
0x1854   :  { %v2455_v44 = vpop.eup %2454 }
0x1855   :  { %1381 = vrot.lane.b32.xlu0 %v2455_v44, %s2529_s28 }
0x185b   :  { %v1063_v15 = vpop.permute.xlu0 %1062 }
0x185c   :  { %v1065_v45 = vadd.f32 %v1063_v15, %v1055_v14 }
0x185e   :  { %2456 = vtanh.f32 %v1065_v45 }
0x1864   :  { %v2457_v46 = vpop.eup %2456 }
0x1865   :  { %1068 = vrot.lane.b32.xlu2 %v2457_v46, %s2529_s28 }
0x18bf   :  { %v1069_v49 = vpop.permute.xlu2 %1068 }
0x18c0   :  { %v1071_v47 = vmul.f32 %v1069_v49, %v1054_v38 }
0x18c2   :  { %1073 = vrot.lane.b32.xlu1 %v1071_v47, %s2530_s29 }
0x18c7   :  { %v1382_v51 = vpop.permute.xlu0 %1381 }
0x18c8   :  { %v1384_v52 = vmul.f32 %v1382_v51, %v1367_v36 }
0x18ca   :  { %1386 = vrot.lane.b32.xlu2 %v1384_v52, %s2530_s29 }
0x1924   :  { %v3081_v55 = vpop.permute.xlu2 %1386 }
0x1934   :  { %v1074_v53 = vpop.permute.xlu1 %1073 }
0x1935   :  { %2337 = vmatmul.msk.f32.vlgmr.msrb.gmra.mxu2 %vm255_vm2, %v1074_v53  ;;  %2353 = vmatmul.msk.f32.vlgmr.msrb.gmra.mxu1 %vm255_vm2, %v1074_v53 }
0x1936   :  { %1311 = vmatpush.msrb.mxu2 %v2952_v58  ;;  %1586 = vmatpush.msrb.mxu1 %v3009_v4 }
0x1938   :  { %1312 = vmatpush.msrb.mxu2 %v2957_v59  ;;  %1587 = vmatpush.msrb.mxu1 %v3014_v6 }
0x193a   :  { %1313 = vmatpush.msrb.mxu2 %v2964_v60  ;;  %1588 = vmatpush.msrb.mxu1 %v3020_v10 }
0x193c   :  { %1314 = vmatpush.msrb.mxu2 %v2973_v31  ;;  %1589 = vmatpush.msrb.mxu1 %v3026_v12 }
0x193d   :  { %2350 = vmatmul.msk.f32.vlgmr.msra.gmra.mxu2 %vm255_vm2, %v2935_v41  ;;  %2356 = vmatmul.msk.f32.vlgmr.msra.gmra.mxu1 %vm255_vm2, %v3081_v55  ;;  %v1217_v41 = vadd.f32 %v3054_v1, %v1216_v56 }
0x193e   :  { %1448 = vmatpush.msra.mxu2 %v3009_v4 }
0x1940   :  { %1449 = vmatpush.msra.mxu2 %v3014_v6 }
0x1942   :  { %1450 = vmatpush.msra.mxu2 %v3020_v10 }
0x1944   :  { %1451 = vmatpush.msra.mxu2 %v3026_v12 }
0x19b2   :  { %v3093_v57 = vpop.f32.mrf.mxu1 }
0x19b8   :  { %v1094_v63 = vpop.f32.mrf.mxu2 }
0x19b9   :  { %v1097_v0 = vadd.f32 %v1094_v63, %v774_v62 }
0x19ba   :  { %v1407_v25 = vpop.f32.mrf.mxu1 }
0x19bb   :  { %2458 = vtanh.f32 %v1097_v0  ;;  %v1410_v26 = vadd.f32 %v1407_v25, %v1217_v41 }
0x19bd   :  { %2460 = vtanh.f32 %v1410_v26 }
0x19c1   :  { %v2459_v27 = vpop.eup %2458 }
0x19c2   :  { %v1099_v30 = vmul.f32 %v3101_v5, %v2459_v27 }
0x19c3   :  { %v2461_v11 = vpop.eup %2460 }
0x19c4   :  { %v1412_v2 = vmul.f32 %v3101_v5, %v2461_v11  ;;  %v1100_v24 = vadd.f32 %v3108_v28, %v1099_v30 }
0x19c6   :  { %1103 = vrot.lane.b32.xlu0 %v1100_v24, %s2529_s28  ;;  %v1413_v54 = vadd.f32 %v3108_v28, %v1412_v2  ;;  %v1101_v18 = vmul.f32 %v1100_v24, %v1065_v45 }
0x19c8   :  { %1416 = vrot.lane.b32.xlu1 %v1413_v54, %s2529_s28  ;;  %v1414_v23 = vmul.f32 %v1413_v54, %v3065_v43 }
0x1a38   :  { %v1104_v13 = vpop.permute.xlu0 %1103 }
0x1a39   :  { %v1106_v3 = vmul.f32 %v1104_v13, %v1100_v24 }
0x1a3a   :  { %v1417_v16 = vpop.permute.xlu1 %1416 }
0x1a3b   :  { %v1419_v17 = vmul.f32 %v1417_v16, %v1413_v54  ;;  %1108 = vrot.lane.b32.xlu2 %v1106_v3, %s2530_s29 }
0x1a3d   :  { %1421 = vrot.lane.b32.xlu0 %v1419_v17, %s2530_s29 }
0x1a95   :  { %v1109_v19 = vpop.permute.xlu2 %1108 }
0x1a96   :  { %v1111_v21 = vadd.f32 %v1109_v19, %v1101_v18 }
0x1a98   :  { %2462 = vtanh.f32 %v1111_v21 }
0x1a9e   :  { %v2463_v22 = vpop.eup %2462 }
0x1a9f   :  { %1114 = vrot.lane.b32.xlu1 %v2463_v22, %s2529_s28 }
0x1aaf   :  { %v1422_v32 = vpop.permute.xlu0 %1421 }
0x1ab0   :  { %v1424_v33 = vadd.f32 %v1422_v32, %v1414_v23  ;;  %v3179_v32 = vld [vmem:[%s3437_s2 + $0x58] sm:$0xff] }
0x1ab1   :  { %1734 = vmatpush.msra.mxu0 %v3179_v32  ;;  %1754 = vmatpush.msra.mxu1 %v3179_v32 }
0x1ab2   :  { %2464 = vtanh.f32 %v1424_v33 }
0x1ab8   :  { %v2465_v34 = vpop.eup %2464 }
0x1ab9   :  { %1427 = vrot.lane.b32.xlu2 %v2465_v34, %s2529_s28  ;;  %v3191_v34 = vld [vmem:[%s3437_s2 + $0x48] sm:$0xff] }
0x1b11   :  { %v1115_v38 = vpop.permute.xlu1 %1114 }
0x1b12   :  { %v1117_v8 = vmul.f32 %v1115_v38, %v1100_v24  ;;  %v3200_v38 = vld [vmem:[%s3437_s2 + $0x40] sm:$0xff] }
0x1b13   :  { %v1428_v35 = vpop.permute.xlu2 %1427 }
0x1b14   :  { %v1430_v36 = vmul.f32 %v1428_v35, %v1413_v54  ;;  %1119 = vrot.lane.b32.xlu0 %v1117_v8, %s2530_s29  ;;  %v1277_v35 = vadd.f32 %v3054_v1, %v3049_v20 }
0x1b16   :  { %1432 = vrot.lane.b32.xlu1 %v1430_v36, %s2530_s29 }
0x1b86   :  { %v1120_v37 = vpop.permute.xlu0 %1119 }
0x1b87   :  { %2338 = vmatmul.msk.f32.vlgmr.msrb.gmra.mxu3 %vm255_vm2, %v1120_v37  ;;  %2354 = vmatmul.msk.f32.vlgmr.msrb.gmra.mxu2 %vm255_vm2, %v1120_v37 }
0x1b88   :  { %1336 = vmatpush.msrb.mxu3 %v2952_v58  ;;  %1632 = vmatpush.msrb.mxu2 %v3009_v4  ;;  %v3129_v39 = vpop.permute.xlu1 %1432  ;;  %v1236_v58 = vpop.f32.mrf.mxu2 }
0x1b8a   :  { %1337 = vmatpush.msrb.mxu3 %v2957_v59  ;;  %1633 = vmatpush.msrb.mxu2 %v3014_v6  ;;  %v799_v59 = vadd.f32 %v2842_v48, %v2940_v50 }
0x1b8c   :  { %1338 = vmatpush.msrb.mxu3 %v2964_v60  ;;  %1634 = vmatpush.msrb.mxu2 %v3020_v10 }
0x1b8e   :  { %1339 = vmatpush.msrb.mxu3 %v2973_v31  ;;  %1635 = vmatpush.msrb.mxu2 %v3026_v12 }
0x1b8f   :  { %2351 = vmatmul.msk.f32.vlgmr.msra.gmra.mxu3 %vm255_vm2, %v2985_v61  ;;  %2357 = vmatmul.msk.f32.vlgmr.msra.gmra.mxu2 %vm255_vm2, %v3129_v39  ;;  %v1237_v61 = vadd.f32 %v3054_v1, %v1236_v58 }
0x1b90   :  { %1494 = vmatpush.msra.mxu3 %v3009_v4  ;;  %1774 = vmatpush.msra.mxu2 %v3179_v32 }
0x1b92   :  { %1495 = vmatpush.msra.mxu3 %v3014_v6 }
0x1b94   :  { %1496 = vmatpush.msra.mxu3 %v3020_v10 }
0x1b96   :  { %1497 = vmatpush.msra.mxu3 %v3026_v12 }
0x1c0a   :  { %v1140_v60 = vpop.f32.mrf.mxu3  ;;  %v3143_v31 = vpop.f32.mrf.mxu2 }
0x1c0b   :  { %v1143_v40 = vadd.f32 %v1140_v60, %v799_v59 }
0x1c0d   :  { %2466 = vtanh.f32 %v1143_v40 }
0x1c12   :  { %v1453_v29 = vpop.f32.mrf.mxu2  ;;  %v1256_v2 = vpop.f32.mrf.mxu3 }
0x1c13   :  { %v2467_v42 = vpop.eup %2466  ;;  %v1456_v9 = vadd.f32 %v1453_v29, %v1237_v61  ;;  %v1257_v54 = vadd.f32 %v3054_v1, %v1256_v2 }
0x1c14   :  { %v1145_v43 = vmul.f32 %v3101_v5, %v2467_v42 }
0x1c15   :  { %2468 = vtanh.f32 %v1456_v9 }
0x1c16   :  { %v1146_v44 = vadd.f32 %v3108_v28, %v1145_v43 }
0x1c18   :  { %1149 = vrot.lane.b32.xlu2 %v1146_v44, %s2529_s28  ;;  %v1147_v47 = vmul.f32 %v1146_v44, %v1111_v21 }
0x1c1b   :  { %v2469_v14 = vpop.eup %2468 }
0x1c1c   :  { %v1458_v48 = vmul.f32 %v3101_v5, %v2469_v14  ;;  %v3238_v14 = vld [vmem:[%s3433_s3 + $0x70] sm:$0xff] }
0x1c1e   :  { %v1459_v50 = vadd.f32 %v3108_v28, %v1458_v48  ;;  %v3244_v48 = vld [vmem:[%s3433_s3 + $0x68] sm:$0xff] }
0x1c20   :  { %1462 = vrot.lane.b32.xlu0 %v1459_v50, %s2529_s28  ;;  %v1460_v53 = vmul.f32 %v1459_v50, %v1424_v33  ;;  %v3184_v33 = vld [vmem:[%s3437_s2 + $0x50] sm:$0xff] }
0x1c21   :  { %1735 = vmatpush.msra.mxu0 %v3184_v33  ;;  %1755 = vmatpush.msra.mxu1 %v3184_v33 }
0x1c22   :  { %1775 = vmatpush.msra.mxu2 %v3184_v33 }
0x1c23   :  { %1736 = vmatpush.msra.mxu0 %v3191_v34  ;;  %1756 = vmatpush.msra.mxu1 %v3191_v34 }
0x1c24   :  { %1776 = vmatpush.msra.mxu2 %v3191_v34 }
0x1c25   :  { %1737 = vmatpush.msra.mxu0 %v3200_v38  ;;  %1757 = vmatpush.msra.mxu1 %v3200_v38 }
0x1c26   :  { %1777 = vmatpush.msra.mxu2 %v3200_v38 }
0x1c72   :  { %v1150_v15 = vpop.permute.xlu2 %1149 }
0x1c73   :  { %v1152_v45 = vmul.f32 %v1150_v15, %v1146_v44 }
0x1c75   :  { %1154 = vrot.lane.b32.xlu1 %v1152_v45, %s2530_s29 }
0x1c92   :  { %v1463_v46 = vpop.permute.xlu0 %1462 }
0x1c93   :  { %v1465_v49 = vmul.f32 %v1463_v46, %v1459_v50  ;;  %v1297_v46 = vadd.f32 %v3054_v1, %v3093_v57 }
0x1c95   :  { %1467 = vrot.lane.b32.xlu2 %v1465_v49, %s2530_s29 }
0x1ce7   :  { %v1155_v51 = vpop.permute.xlu1 %1154 }
0x1ce8   :  { %v1157_v52 = vadd.f32 %v1155_v51, %v1147_v47 }
0x1cea   :  { %2470 = vtanh.f32 %v1157_v52 }
0x1cef   :  { %v1468_v56 = vpop.permute.xlu2 %1467 }
0x1cf0   :  { %v2471_v62 = vpop.eup %2470  ;;  %v1470_v63 = vadd.f32 %v1468_v56, %v1460_v53 }
0x1cf1   :  { %1160 = vrot.lane.b32.xlu0 %v2471_v62, %s2529_s28 }
0x1cf2   :  { %2472 = vtanh.f32 %v1470_v63 }
0x1cf8   :  { %v2473_v41 = vpop.eup %2472 }
0x1cf9   :  { %1473 = vrot.lane.b32.xlu1 %v2473_v41, %s2529_s28 }
0x1d63   :  { %v1161_v0 = vpop.permute.xlu0 %1160 }
0x1d64   :  { %v1163_v25 = vmul.f32 %v1161_v0, %v1146_v44  ;;  %v3233_v44 = vld [vmem:[%s3433_s3 + $0x78] sm:$0xff] }
0x1d66   :  { %1320 = vrot.lane.b32.xlu2 %v1163_v25, %s2530_s29 }
0x1d6b   :  { %v1474_v26 = vpop.permute.xlu1 %1473 }
0x1d6c   :  { %v1476_v27 = vmul.f32 %v1474_v26, %v1459_v50  ;;  %v3250_v50 = vld [vmem:[%s3433_s3 + $0x60] sm:$0xff] }
0x1d6e   :  { %1478 = vrot.lane.b32.xlu0 %v1476_v27, %s2530_s29 }
0x1dc0   :  { %v1321_v30 = vpop.permute.xlu2 %1320 }
0x1dc1   :  { %2355 = vmatmul.msk.f32.vlgmr.msrb.gmra.mxu3 %vm255_vm2, %v1321_v30 }
0x1dc2   :  { %1678 = vmatpush.msrb.mxu3 %v3009_v4 }
0x1dc4   :  { %1679 = vmatpush.msrb.mxu3 %v3014_v6 }
0x1dc6   :  { %1680 = vmatpush.msrb.mxu3 %v3020_v10 }
0x1dc8   :  { %1681 = vmatpush.msrb.mxu3 %v3026_v12 }
0x1de0   :  { %v3163_v11 = vpop.permute.xlu0 %1478 }
0x1de1   :  { %2358 = vmatmul.msk.f32.vlgmr.msra.gmra.mxu3 %vm255_vm2, %v3163_v11 }
0x1de2   :  { %1794 = vmatpush.msra.mxu3 %v3179_v32 }
0x1de4   :  { %1795 = vmatpush.msra.mxu3 %v3184_v33 }
0x1de6   :  { %1796 = vmatpush.msra.mxu3 %v3191_v34 }
0x1de8   :  { %1797 = vmatpush.msra.mxu3 %v3200_v38 }
0x1e44   :  { %v3167_v24 = vpop.f32.mrf.mxu3 }
0x1e64   :  { %v1499_v13 = vpop.f32.mrf.mxu3 }
0x1e65   :  { %v1502_v3 = vadd.f32 %v1499_v13, %v1257_v54 }
0x1e67   :  { %2474 = vtanh.f32 %v1502_v3 }
0x1e6d   :  { %v2475_v4 = vpop.eup %2474 }
0x1e6e   :  { %v1504_v6 = vmul.f32 %v3101_v5, %v2475_v4 }
0x1e70   :  { %v1505_v10 = vadd.f32 %v3108_v28, %v1504_v6 }
0x1e72   :  { %1508 = vrot.lane.b32.xlu1 %v1505_v10, %s2529_s28  ;;  %v1506_v17 = vmul.f32 %v1505_v10, %v1470_v63 }
0x1ee4   :  { %v1509_v12 = vpop.permute.xlu1 %1508 }
0x1ee5   :  { %v1511_v16 = vmul.f32 %v1509_v12, %v1505_v10 }
0x1ee7   :  { %1513 = vrot.lane.b32.xlu2 %v1511_v16, %s2530_s29 }
0x1f41   :  { %v1514_v18 = vpop.permute.xlu2 %1513 }
0x1f42   :  { %v1516_v19 = vadd.f32 %v1514_v18, %v1506_v17 }
0x1f44   :  { %2476 = vtanh.f32 %v1516_v19 }
0x1f4a   :  { %v2477_v21 = vpop.eup %2476 }
0x1f4b   :  { %1519 = vrot.lane.b32.xlu0 %v2477_v21, %s2529_s28 }
0x1fbd   :  { %v1520_v22 = vpop.permute.xlu0 %1519 }
0x1fbe   :  { %v1522_v23 = vmul.f32 %v1520_v22, %v1505_v10 }
0x1fc0   :  { %1524 = vrot.lane.b32.xlu1 %v1522_v23, %s2530_s29 }
0x2032   :  { %v3212_v8 = vpop.permute.xlu1 %1524 }
0x2033   :  { %2359 = vmatmul.msk.f32.vlgmr.msrb.gmra.mxu0 %vm255_vm2, %v3212_v8 }
0x2034   :  { %1814 = vmatpush.msrb.mxu0 %v3179_v32 }
0x2036   :  { %1815 = vmatpush.msrb.mxu0 %v3184_v33 }
0x2038   :  { %1816 = vmatpush.msrb.mxu0 %v3191_v34 }
0x203a   :  { %1817 = vmatpush.msrb.mxu0 %v3200_v38 }
0x203b   :  { %2372 = vmatmul.msk.f32.vlgmr.msra.gmra.mxu0 %vm255_vm2, %v3081_v55 }
0x203c   :  { %1899 = vmatpush.msra.mxu0 %v3233_v44 }
0x203e   :  { %1900 = vmatpush.msra.mxu0 %v3238_v14 }
0x2040   :  { %1901 = vmatpush.msra.mxu0 %v3244_v48 }
0x2042   :  { %1902 = vmatpush.msra.mxu0 %v3250_v50 }
0x20b0   :  { %v1545_v36 = vpop.f32.mrf.mxu0 }
0x20b1   :  { %v1548_v37 = vadd.f32 %v1545_v36, %v1277_v35  ;;  %v1317_v36 = vadd.f32 %v3054_v1, %v3143_v31 }
0x20b3   :  { %2478 = vtanh.f32 %v1548_v37 }
0x20b8   :  { %v1739_v45 = vpop.f32.mrf.mxu0 }
0x20b9   :  { %v2479_v58 = vpop.eup %2478 }
0x20ba   :  { %v1550_v59 = vmul.f32 %v3101_v5, %v2479_v58 }
0x20bc   :  { %v1551_v60 = vadd.f32 %v3108_v28, %v1550_v59 }
0x20be   :  { %1554 = vrot.lane.b32.xlu2 %v1551_v60, %s2529_s28  ;;  %v1552_v29 = vmul.f32 %v1551_v60, %v1516_v19 }
0x2118   :  { %v1555_v40 = vpop.permute.xlu2 %1554 }
0x2119   :  { %v1557_v61 = vmul.f32 %v1555_v40, %v1551_v60 }
0x211b   :  { %1559 = vrot.lane.b32.xlu0 %v1557_v61, %s2530_s29 }
0x218d   :  { %v1560_v42 = vpop.permute.xlu0 %1559 }
0x218e   :  { %v1562_v55 = vadd.f32 %v1560_v42, %v1552_v29 }
0x2190   :  { %2480 = vtanh.f32 %v1562_v55 }
0x2196   :  { %v2481_v9 = vpop.eup %2480 }
0x2197   :  { %1565 = vrot.lane.b32.xlu1 %v2481_v9, %s2529_s28 }
0x2209   :  { %v1566_v20 = vpop.permute.xlu1 %1565 }
0x220a   :  { %v1568_v43 = vmul.f32 %v1566_v20, %v1551_v60 }
0x220c   :  { %1570 = vrot.lane.b32.xlu2 %v1568_v43, %s2530_s29 }
0x2266   :  { %v1571_v15 = vpop.permute.xlu2 %1570 }
0x2267   :  { %2360 = vmatmul.msk.f32.vlgmr.msrb.gmra.mxu1 %vm255_vm2, %v1571_v15  ;;  %2376 = vmatmul.msk.f32.vlgmr.msrb.gmra.mxu0 %vm255_vm2, %v1571_v15 }
0x2268   :  { %1834 = vmatpush.msrb.mxu1 %v3179_v32  ;;  %2083 = vmatpush.msrb.mxu0 %v3233_v44 }
0x226a   :  { %1835 = vmatpush.msrb.mxu1 %v3184_v33  ;;  %2084 = vmatpush.msrb.mxu0 %v3238_v14 }
0x226c   :  { %1836 = vmatpush.msrb.mxu1 %v3191_v34  ;;  %2085 = vmatpush.msrb.mxu0 %v3244_v48 }
0x226e   :  { %1837 = vmatpush.msrb.mxu1 %v3200_v38  ;;  %2086 = vmatpush.msrb.mxu0 %v3250_v50 }
0x226f   :  { %2373 = vmatmul.msk.f32.vlgmr.msra.gmra.mxu1 %vm255_vm2, %v3129_v39  ;;  %1903 = vmatmul.f32.vlgmr.msra.gmra.mxu0 %v2528_v7  ;;  %v3278_v7 = vld [vmem:[%s3434_s4 + $0x3] ss:$0 sm:$0xff] }
0x2270   :  { %1945 = vmatpush.msra.mxu1 %v3233_v44  ;;  %v1740_v39 = vadd.f32 %v3278_v7, %v1739_v45 }
0x2272   :  { %1946 = vmatpush.msra.mxu1 %v3238_v14 }
0x2274   :  { %1947 = vmatpush.msra.mxu1 %v3244_v48 }
0x2276   :  { %1948 = vmatpush.msra.mxu1 %v3250_v50 }
0x22e4   :  { %v1591_v49 = vpop.f32.mrf.mxu1  ;;  %v3273_v47 = vpop.f32.mrf.mxu0 }
0x22e5   :  { %v1594_v51 = vadd.f32 %v1591_v49, %v1297_v46 }
0x22e7   :  { %2482 = vtanh.f32 %v1594_v51 }
0x22ec   :  { %v1904_v52 = vpop.f32.mrf.mxu0  ;;  %v1759_v23 = vpop.f32.mrf.mxu1 }
0x22ed   :  { %v2483_v53 = vpop.eup %2482  ;;  %v1907_v56 = vadd.f32 %v1904_v52, %v1740_v39  ;;  %v1760_v58 = vadd.f32 %v3278_v7, %v1759_v23 }
0x22ee   :  { %v1596_v62 = vmul.f32 %v3101_v5, %v2483_v53 }
0x22ef   :  { %2484 = vtanh.f32 %v1907_v56 }
0x22f0   :  { %v1597_v57 = vadd.f32 %v3108_v28, %v1596_v62 }
0x22f2   :  { %1600 = vrot.lane.b32.xlu0 %v1597_v57, %s2529_s28  ;;  %v1598_v2 = vmul.f32 %v1597_v57, %v1562_v55 }
0x22f5   :  { %v2485_v63 = vpop.eup %2484 }
0x22f6   :  { %v1909_v41 = vmul.f32 %v3101_v5, %v2485_v63 }
0x22f8   :  { %v1910_v0 = vadd.f32 %v3108_v28, %v1909_v41 }
0x22fa   :  { %1913 = vrot.lane.b32.xlu1 %v1910_v0, %s2529_s28  ;;  %v1911_v4 = vmul.f32 0.0, %v1910_v0 }
0x2364   :  { %v1601_v25 = vpop.permute.xlu0 %1600 }
0x2365   :  { %v1603_v26 = vmul.f32 %v1601_v25, %v1597_v57 }
0x2367   :  { %1605 = vrot.lane.b32.xlu2 %v1603_v26, %s2530_s29 }
0x236c   :  { %v1914_v27 = vpop.permute.xlu1 %1913 }
0x236d   :  { %v1916_v30 = vmul.f32 %v1914_v27, %v1910_v0 }
0x236f   :  { %1918 = vrot.lane.b32.xlu0 %v1916_v30, %s2530_s29 }
0x23c1   :  { %v1606_v54 = vpop.permute.xlu2 %1605 }
0x23c2   :  { %v1608_v13 = vadd.f32 %v1606_v54, %v1598_v2 }
0x23c4   :  { %2486 = vtanh.f32 %v1608_v13 }
0x23ca   :  { %v2487_v3 = vpop.eup %2486 }
0x23cb   :  { %1611 = vrot.lane.b32.xlu1 %v2487_v3, %s2529_s28 }
0x23e1   :  { %v1919_v6 = vpop.permute.xlu0 %1918 }
0x23e2   :  { %v1921_v10 = vadd.f32 %v1919_v6, %v1911_v4 }
0x23e4   :  { %2488 = vtanh.f32 %v1921_v10 }
0x23ea   :  { %v2489_v12 = vpop.eup %2488 }
0x23eb   :  { %1924 = vrot.lane.b32.xlu2 %v2489_v12, %s2529_s28 }
0x243d   :  { %v1612_v16 = vpop.permute.xlu1 %1611 }
0x243e   :  { %v1614_v17 = vmul.f32 %v1612_v16, %v1597_v57 }
0x2440   :  { %1616 = vrot.lane.b32.xlu0 %v1614_v17, %s2530_s29 }
0x2445   :  { %v1925_v18 = vpop.permute.xlu2 %1924 }
0x2446   :  { %v1927_v19 = vmul.f32 %v1925_v18, %v1910_v0 }
0x2448   :  { %1929 = vrot.lane.b32.xlu1 %v1927_v19, %s2530_s29 }
0x24b2   :  { %v1617_v21 = vpop.permute.xlu0 %1616 }
0x24b3   :  { %2361 = vmatmul.msk.f32.vlgmr.msrb.gmra.mxu2 %vm255_vm2, %v1617_v21  ;;  %2377 = vmatmul.msk.f32.vlgmr.msrb.gmra.mxu1 %vm255_vm2, %v1617_v21 }
0x24b4   :  { %1854 = vmatpush.msrb.mxu2 %v3179_v32  ;;  %2129 = vmatpush.msrb.mxu1 %v3233_v44 }
0x24b6   :  { %1855 = vmatpush.msrb.mxu2 %v3184_v33  ;;  %2130 = vmatpush.msrb.mxu1 %v3238_v14 }
0x24b8   :  { %1856 = vmatpush.msrb.mxu2 %v3191_v34  ;;  %2131 = vmatpush.msrb.mxu1 %v3244_v48 }
0x24ba   :  { %v1930_v22 = vpop.permute.xlu1 %1929  ;;  %1857 = vmatpush.msrb.mxu2 %v3200_v38  ;;  %2132 = vmatpush.msrb.mxu1 %v3250_v50 }
0x24bb   :  { %2374 = vmatmul.msk.f32.vlgmr.msra.gmra.mxu2 %vm255_vm2, %v3163_v11  ;;  %2380 = vmatmul.msk.f32.vlgmr.msra.gmra.mxu1 %vm255_vm2, %v1930_v22 }
0x24bc   :  { %1991 = vmatpush.msra.mxu2 %v3233_v44 }
0x24be   :  { %1992 = vmatpush.msra.mxu2 %v3238_v14 }
0x24c0   :  { %1993 = vmatpush.msra.mxu2 %v3244_v48 }
0x24c2   :  { %1994 = vmatpush.msra.mxu2 %v3250_v50 }
0x2530   :  { %v3310_v35 = vpop.f32.mrf.mxu1 }
0x2536   :  { %v1637_v37 = vpop.f32.mrf.mxu2 }
0x2537   :  { %v1640_v11 = vadd.f32 %v1637_v37, %v1317_v36 }
0x2538   :  { %v1950_v59 = vpop.f32.mrf.mxu1 }
0x2539   :  { %2490 = vtanh.f32 %v1640_v11  ;;  %v1953_v60 = vadd.f32 %v1950_v59, %v1760_v58 }
0x253b   :  { %2492 = vtanh.f32 %v1953_v60 }
0x253e   :  { %v1779_v26 = vpop.f32.mrf.mxu2 }
0x253f   :  { %v2491_v40 = vpop.eup %2490  ;;  %v1780_v2 = vadd.f32 %v3278_v7, %v1779_v26  ;;  %v1840_v26 = vadd.f32 %v3278_v7, %v3310_v35 }
0x2540   :  { %v1642_v61 = vmul.f32 %v3101_v5, %v2491_v40 }
0x2541   :  { %v2493_v29 = vpop.eup %2492 }
0x2542   :  { %v1955_v42 = vmul.f32 %v3101_v5, %v2493_v29  ;;  %v1643_v55 = vadd.f32 %v3108_v28, %v1642_v61 }
0x2544   :  { %1646 = vrot.lane.b32.xlu2 %v1643_v55, %s2529_s28  ;;  %v1956_v31 = vadd.f32 %v3108_v28, %v1955_v42  ;;  %v1644_v45 = vmul.f32 %v1643_v55, %v1608_v13 }
0x2546   :  { %1959 = vrot.lane.b32.xlu0 %v1956_v31, %s2529_s28  ;;  %v1957_v51 = vmul.f32 %v1956_v31, %v1921_v10 }
0x259e   :  { %v1647_v9 = vpop.permute.xlu2 %1646 }
0x259f   :  { %v1649_v20 = vmul.f32 %v1647_v9, %v1643_v55 }
0x25a1   :  { %1651 = vrot.lane.b32.xlu1 %v1649_v20, %s2530_s29 }
0x25b8   :  { %v1960_v43 = vpop.permute.xlu0 %1959 }
0x25b9   :  { %v1962_v15 = vmul.f32 %v1960_v43, %v1956_v31 }
0x25bb   :  { %1964 = vrot.lane.b32.xlu2 %v1962_v15, %s2530_s29 }
0x2613   :  { %v1652_v46 = vpop.permute.xlu1 %1651 }
0x2614   :  { %v1654_v49 = vadd.f32 %v1652_v46, %v1644_v45 }
0x2615   :  { %v1965_v39 = vpop.permute.xlu2 %1964 }
0x2616   :  { %2494 = vtanh.f32 %v1654_v49  ;;  %v1967_v52 = vadd.f32 %v1965_v39, %v1957_v51  ;;  %v1820_v39 = vadd.f32 %v3278_v7, %v3273_v47 }
0x2618   :  { %2496 = vtanh.f32 %v1967_v52 }
0x261c   :  { %v2495_v53 = vpop.eup %2494 }
0x261d   :  { %1657 = vrot.lane.b32.xlu0 %v2495_v53, %s2529_s28 }
0x261e   :  { %v2497_v56 = vpop.eup %2496 }
0x261f   :  { %1970 = vrot.lane.b32.xlu1 %v2497_v56, %s2529_s28 }
0x268f   :  { %v1658_v62 = vpop.permute.xlu0 %1657 }
0x2690   :  { %v1660_v57 = vmul.f32 %v1658_v62, %v1643_v55 }
0x2691   :  { %v1971_v63 = vpop.permute.xlu1 %1970 }
0x2692   :  { %v1973_v41 = vmul.f32 %v1971_v63, %v1956_v31  ;;  %1662 = vrot.lane.b32.xlu2 %v1660_v57, %s2530_s29 }
0x2694   :  { %1975 = vrot.lane.b32.xlu0 %v1973_v41, %s2530_s29 }
0x26ec   :  { %v1663_v0 = vpop.permute.xlu2 %1662 }
0x26ed   :  { %2362 = vmatmul.msk.f32.vlgmr.msrb.gmra.mxu3 %vm255_vm2, %v1663_v0  ;;  %2378 = vmatmul.msk.f32.vlgmr.msrb.gmra.mxu2 %vm255_vm2, %v1663_v0 }
0x26ee   :  { %1879 = vmatpush.msrb.mxu3 %v3179_v32  ;;  %2175 = vmatpush.msrb.mxu2 %v3233_v44 }
0x26f0   :  { %1880 = vmatpush.msrb.mxu3 %v3184_v33  ;;  %2176 = vmatpush.msrb.mxu2 %v3238_v14  ;;  %v1342_v33 = vadd.f32 %v3054_v1, %v3167_v24 }
0x26f2   :  { %1881 = vmatpush.msrb.mxu3 %v3191_v34  ;;  %2177 = vmatpush.msrb.mxu2 %v3244_v48 }
0x26f4   :  { %1882 = vmatpush.msrb.mxu3 %v3200_v38  ;;  %2178 = vmatpush.msrb.mxu2 %v3250_v50 }
0x26f5   :  { %2375 = vmatmul.msk.f32.vlgmr.msra.gmra.mxu3 %vm255_vm2, %v3212_v8 }
0x26f6   :  { %2037 = vmatpush.msra.mxu3 %v3233_v44 }
0x26f8   :  { %2038 = vmatpush.msra.mxu3 %v3238_v14 }
0x26fa   :  { %2039 = vmatpush.msra.mxu3 %v3244_v48 }
0x26fc   :  { %2040 = vmatpush.msra.mxu3 %v3250_v50 }
0x2706   :  { %v1976_v32 = vpop.permute.xlu0 %1975 }
0x2707   :  { %2381 = vmatmul.msk.f32.vlgmr.msra.gmra.mxu2 %vm255_vm2, %v1976_v32 }
0x2770   :  { %v1683_v34 = vpop.f32.mrf.mxu3  ;;  %v3349_v30 = vpop.f32.mrf.mxu2 }
0x2771   :  { %v1686_v38 = vadd.f32 %v1683_v34, %v1342_v33 }
0x2773   :  { %2498 = vtanh.f32 %v1686_v38 }
0x2778   :  { %v1799_v61 = vpop.f32.mrf.mxu3 }
0x2779   :  { %v2499_v25 = vpop.eup %2498  ;;  %v1800_v42 = vadd.f32 %v3278_v7, %v1799_v61 }
0x277a   :  { %v1688_v8 = vmul.f32 %v3101_v5, %v2499_v25 }
0x277c   :  { %v1689_v27 = vadd.f32 %v3108_v28, %v1688_v8 }
0x277e   :  { %1692 = vrot.lane.b32.xlu1 %v1689_v27, %s2529_s28  ;;  %v1690_v16 = vmul.f32 %v1689_v27, %v1654_v49 }
0x278a   :  { %v1996_v54 = vpop.f32.mrf.mxu2 }
0x278b   :  { %v1999_v13 = vadd.f32 %v1996_v54, %v1780_v2 }
0x278d   :  { %2500 = vtanh.f32 %v1999_v13 }
0x2793   :  { %v2501_v3 = vpop.eup %2500 }
0x2794   :  { %v2001_v1 = vmul.f32 %v3101_v5, %v2501_v3 }
0x2796   :  { %v2002_v24 = vadd.f32 %v3108_v28, %v2001_v1 }
0x2798   :  { %2005 = vrot.lane.b32.xlu2 %v2002_v24, %s2529_s28  ;;  %v2003_v19 = vmul.f32 %v2002_v24, %v1967_v52 }
0x27f0   :  { %v1693_v4 = vpop.permute.xlu1 %1692 }
0x27f1   :  { %v1695_v6 = vmul.f32 %v1693_v4, %v1689_v27 }
0x27f2   :  { %v2006_v10 = vpop.permute.xlu2 %2005 }
0x27f3   :  { %v2008_v12 = vmul.f32 %v2006_v10, %v2002_v24  ;;  %1697 = vrot.lane.b32.xlu0 %v1695_v6, %s2530_s29 }
0x27f5   :  { %2010 = vrot.lane.b32.xlu1 %v2008_v12, %s2530_s29 }
0x2865   :  { %v1698_v17 = vpop.permute.xlu0 %1697 }
0x2866   :  { %v1700_v18 = vadd.f32 %v1698_v17, %v1690_v16  ;;  %v1860_v17 = vadd.f32 %v3278_v7, %v3349_v30 }
0x2867   :  { %v2011_v21 = vpop.permute.xlu1 %2010 }
0x2868   :  { %2502 = vtanh.f32 %v1700_v18  ;;  %v2013_v22 = vadd.f32 %v2011_v21, %v2003_v19 }
0x286a   :  { %2504 = vtanh.f32 %v2013_v22 }
0x286e   :  { %v2503_v23 = vpop.eup %2502 }
0x286f   :  { %1703 = vrot.lane.b32.xlu2 %v2503_v23, %s2529_s28 }
0x2870   :  { %v2505_v36 = vpop.eup %2504 }
0x2871   :  { %2016 = vrot.lane.b32.xlu0 %v2505_v36, %s2529_s28 }
0x28c9   :  { %v1704_v37 = vpop.permute.xlu2 %1703 }
0x28ca   :  { %v1706_v58 = vmul.f32 %v1704_v37, %v1689_v27 }
0x28cc   :  { %1863 = vrot.lane.b32.xlu1 %v1706_v58, %s2530_s29 }
0x28e3   :  { %v2017_v11 = vpop.permute.xlu0 %2016 }
0x28e4   :  { %v2019_v59 = vmul.f32 %v2017_v11, %v2002_v24 }
0x28e6   :  { %2021 = vrot.lane.b32.xlu2 %v2019_v59, %s2530_s29 }
0x293e   :  { %v1864_v60 = vpop.permute.xlu1 %1863 }
0x293f   :  { %2379 = vmatmul.msk.f32.vlgmr.msrb.gmra.mxu3 %vm255_vm2, %v1864_v60 }
0x2940   :  { %2221 = vmatpush.msrb.mxu3 %v3233_v44  ;;  %v2022_v40 = vpop.permute.xlu2 %2021 }
0x2942   :  { %2222 = vmatpush.msrb.mxu3 %v3238_v14 }
0x2944   :  { %2223 = vmatpush.msrb.mxu3 %v3244_v48 }
0x2946   :  { %2224 = vmatpush.msrb.mxu3 %v3250_v50 }
0x2947   :  { %2382 = vmatmul.msk.f32.vlgmr.msra.gmra.mxu3 %vm255_vm2, %v2022_v40 }
0x29c2   :  { %v3367_v29 = vpop.f32.mrf.mxu3 }
0x29ca   :  { %v2042_v55 = vpop.f32.mrf.mxu3 }
0x29cb   :  { %v2045_v31 = vadd.f32 %v2042_v55, %v1800_v42  ;;  %v1885_v42 = vadd.f32 %v3278_v7, %v3367_v29  ;;  %v2253_v7 = vld [vmem:[%s3438_s7 + $0x18] sm:$0xff]  ;;  %v2250_v29 = vld [vmem:[%s3438_s7] sm:$0xff] }
0x29cc   :  { %2275 = vmatpush.msra.mxu0 %v2253_v7 }
0x29cd   :  { %2506 = vtanh.f32 %v2045_v31 }
0x29d3   :  { %v2507_v9 = vpop.eup %2506 }
0x29d4   :  { %v2047_v44 = vmul.f32 %v3101_v5, %v2507_v9 }
0x29d6   :  { %v2048_v14 = vadd.f32 %v3108_v28, %v2047_v44 }
0x29d8   :  { %2051 = vrot.lane.b32.xlu0 %v2048_v14, %s2529_s28  ;;  %v2049_v50 = vmul.f32 %v2048_v14, %v2013_v22 }
0x2a4a   :  { %v2052_v48 = vpop.permute.xlu0 %2051 }
0x2a4b   :  { %v2054_v20 = vmul.f32 %v2052_v48, %v2048_v14 }
0x2a4d   :  { %2056 = vrot.lane.b32.xlu1 %v2054_v20, %s2530_s29 }
0x2abf   :  { %v2057_v43 = vpop.permute.xlu1 %2056 }
0x2ac0   :  { %v2059_v15 = vadd.f32 %v2057_v43, %v2049_v50 }
0x2ac2   :  { %2508 = vtanh.f32 %v2059_v15 }
0x2ac8   :  { %v2509_v45 = vpop.eup %2508 }
0x2ac9   :  { %2062 = vrot.lane.b32.xlu2 %v2509_v45, %s2529_s28 }
0x2b23   :  { %v2063_v46 = vpop.permute.xlu2 %2062 }
0x2b24   :  { %v2065_v49 = vmul.f32 %v2063_v46, %v2048_v14 }
0x2b26   :  { %2067 = vrot.lane.b32.xlu0 %v2065_v49, %s2530_s29 }
0x2b98   :  { %v2068_v51 = vpop.permute.xlu0 %2067 }
0x2b99   :  { %2383 = vmatmul.msk.f32.vlgmr.msrb.gmra.mxu0 %vm255_vm2, %v2068_v51  ;;  %v14_v51 = vstv %s3439_s8 }
0x2b9a   :  { %15 = vst [vmem:[#allocation2] sm:$0x1] %v14_v51 }
0x2c16   :  { %v2088_v52 = vpop.f32.mrf.mxu0 }
0x2c17   :  { %v2091_v53 = vadd.f32 %v2088_v52, %v1820_v39  ;;  %v2397_v52 = vld [vmem:[#allocation2] ss:$0 sm:$0xff] }
0x2c19   :  { %2510 = vtanh.f32 %v2091_v53 }
0x2c1f   :  { %v2511_v56 = vpop.eup %2510 }
0x2c20   :  { %v2093_v62 = vmul.f32 %v3101_v5, %v2511_v56 }
0x2c22   :  { %v2094_v57 = vadd.f32 %v3108_v28, %v2093_v62 }
0x2c24   :  { %2097 = vrot.lane.b32.xlu1 %v2094_v57, %s2529_s28  ;;  %v2095_v0 = vmul.f32 %v2094_v57, %v2059_v15 }
0x2c96   :  { %v2098_v63 = vpop.permute.xlu1 %2097 }
0x2c97   :  { %v2100_v41 = vmul.f32 %v2098_v63, %v2094_v57 }
0x2c99   :  { %2102 = vrot.lane.b32.xlu2 %v2100_v41, %s2530_s29 }
0x2cf3   :  { %v2103_v32 = vpop.permute.xlu2 %2102 }
0x2cf4   :  { %v2105_v33 = vadd.f32 %v2103_v32, %v2095_v0 }
0x2cf6   :  { %2512 = vtanh.f32 %v2105_v33 }
0x2cfc   :  { %v2513_v34 = vpop.eup %2512 }
0x2cfd   :  { %2108 = vrot.lane.b32.xlu0 %v2513_v34, %s2529_s28 }
0x2d6f   :  { %v2109_v47 = vpop.permute.xlu0 %2108 }
0x2d70   :  { %v2111_v38 = vmul.f32 %v2109_v47, %v2094_v57 }
0x2d72   :  { %2113 = vrot.lane.b32.xlu1 %v2111_v38, %s2530_s29 }
0x2de4   :  { %v2114_v25 = vpop.permute.xlu1 %2113 }
0x2de5   :  { %2384 = vmatmul.msk.f32.vlgmr.msrb.gmra.mxu1 %vm255_vm2, %v2114_v25 }
0x2e62   :  { %v2134_v8 = vpop.f32.mrf.mxu1 }
0x2e63   :  { %v2137_v27 = vadd.f32 %v2134_v8, %v1840_v26 }
0x2e65   :  { %2514 = vtanh.f32 %v2137_v27 }
0x2e6b   :  { %v2515_v2 = vpop.eup %2514 }
0x2e6c   :  { %v2139_v54 = vmul.f32 %v3101_v5, %v2515_v2 }
0x2e6e   :  { %v2140_v13 = vadd.f32 %v3108_v28, %v2139_v54 }
0x2e70   :  { %2143 = vrot.lane.b32.xlu2 %v2140_v13, %s2529_s28  ;;  %v2141_v24 = vmul.f32 %v2140_v13, %v2105_v33 }
0x2eca   :  { %v2144_v3 = vpop.permute.xlu2 %2143 }
0x2ecb   :  { %v2146_v1 = vmul.f32 %v2144_v3, %v2140_v13 }
0x2ecd   :  { %2148 = vrot.lane.b32.xlu0 %v2146_v1, %s2530_s29 }
0x2f3f   :  { %v2149_v4 = vpop.permute.xlu0 %2148 }
0x2f40   :  { %v2151_v6 = vadd.f32 %v2149_v4, %v2141_v24 }
0x2f42   :  { %2516 = vtanh.f32 %v2151_v6 }
0x2f48   :  { %v2517_v10 = vpop.eup %2516 }
0x2f49   :  { %2154 = vrot.lane.b32.xlu1 %v2517_v10, %s2529_s28 }
0x2fbb   :  { %v2155_v35 = vpop.permute.xlu1 %2154 }
0x2fbc   :  { %v2157_v12 = vmul.f32 %v2155_v35, %v2140_v13 }
0x2fbe   :  { %2159 = vrot.lane.b32.xlu2 %v2157_v12, %s2530_s29 }
0x3018   :  { %v2160_v16 = vpop.permute.xlu2 %2159 }
0x3019   :  { %2385 = vmatmul.msk.f32.vlgmr.msrb.gmra.mxu2 %vm255_vm2, %v2160_v16 }
0x309c   :  { %v2180_v18 = vpop.f32.mrf.mxu2 }
0x309d   :  { %v2183_v19 = vadd.f32 %v2180_v18, %v1860_v17 }
0x309f   :  { %2518 = vtanh.f32 %v2183_v19 }
0x30a5   :  { %v2519_v21 = vpop.eup %2518 }
0x30a6   :  { %v2185_v22 = vmul.f32 %v3101_v5, %v2519_v21 }
0x30a8   :  { %v2186_v23 = vadd.f32 %v3108_v28, %v2185_v22 }
0x30aa   :  { %2189 = vrot.lane.b32.xlu0 %v2186_v23, %s2529_s28  ;;  %v2187_v58 = vmul.f32 %v2186_v23, %v2151_v6 }
0x311c   :  { %v2190_v36 = vpop.permute.xlu0 %2189 }
0x311d   :  { %v2192_v37 = vmul.f32 %v2190_v36, %v2186_v23 }
0x311f   :  { %2194 = vrot.lane.b32.xlu1 %v2192_v37, %s2530_s29 }
0x3191   :  { %v2195_v11 = vpop.permute.xlu1 %2194 }
0x3192   :  { %v2197_v59 = vadd.f32 %v2195_v11, %v2187_v58 }
0x3194   :  { %2520 = vtanh.f32 %v2197_v59 }
0x319a   :  { %v2521_v60 = vpop.eup %2520 }
0x319b   :  { %2200 = vrot.lane.b32.xlu2 %v2521_v60, %s2529_s28 }
0x31f5   :  { %v2201_v30 = vpop.permute.xlu2 %2200 }
0x31f6   :  { %v2203_v40 = vmul.f32 %v2201_v30, %v2186_v23 }
0x31f8   :  { %2205 = vrot.lane.b32.xlu0 %v2203_v40, %s2530_s29 }
0x326a   :  { %v2206_v61 = vpop.permute.xlu0 %2205 }
0x326b   :  { %2386 = vmatmul.msk.f32.vlgmr.msrb.gmra.mxu3 %vm255_vm2, %v2206_v61 }
0x32ee   :  { %v2226_v55 = vpop.f32.mrf.mxu3 }
0x32ef   :  { %v2229_v31 = vadd.f32 %v2226_v55, %v1885_v42 }
0x32f1   :  { %2522 = vtanh.f32 %v2229_v31 }
0x32f7   :  { %v2523_v9 = vpop.eup %2522 }
0x32f8   :  { %v2231_v44 = vmul.f32 %v3101_v5, %v2523_v9  ;;  %v2252_v5 = vld [vmem:[%s3438_s7 + $0x10] sm:$0xff] }
0x32f9   :  { %2276 = vmatpush.msra.mxu0 %v2252_v5 }
0x32fa   :  { %v2232_v14 = vadd.f32 %v3108_v28, %v2231_v44  ;;  %v2251_v28 = vld [vmem:[%s3438_s7 + $0x8] sm:$0xff] }
0x32fb   :  { %2277 = vmatpush.msra.mxu0 %v2251_v28 }
0x32fc   :  { %2235 = vrot.lane.b32.xlu1 %v2232_v14, %s2529_s28  ;;  %v2233_v50 = vmul.f32 %v2232_v14, %v2197_v59 }
0x32fd   :  { %2278 = vmatpush.msra.mxu0 %v2250_v29 }
0x336e   :  { %v2236_v48 = vpop.permute.xlu1 %2235 }
0x336f   :  { %v2238_v20 = vmul.f32 %v2236_v48, %v2232_v14 }
0x3371   :  { %2240 = vrot.lane.b32.xlu2 %v2238_v20, %s2530_s29 }
0x33cb   :  { %v2241_v43 = vpop.permute.xlu2 %2240 }
0x33cc   :  { %v2243_v15 = vadd.f32 %v2241_v43, %v2233_v50 }
0x33ce   :  { %2524 = vtanh.f32 %v2243_v15 }
0x33d4   :  { %v2525_v45 = vpop.eup %2524 }
0x33d5   :  { %2246 = vrot.lane.b32.xlu0 %v2525_v45, %s2529_s28 }
0x3447   :  { %v2247_v46 = vpop.permute.xlu0 %2246 }
0x3448   :  { %v2249_v49 = vmul.f32 %v2247_v46, %v2232_v14 }
0x344a   :  { %2259 = vrot.lane.b32.xlu1 %v2249_v49, %s2530_s29 }
0x34bc   :  { %v2260_v39 = vpop.permute.xlu1 %2259 }
0x34bd   :  { %2387 = vmatmul.msk.f32.vlgmr.msra.gmra.mxu0 %vm255_vm2, %v2260_v39 }
0x353a   :  { %v2280_v53 = vpop.f32.mrf.mxu0 }
0x353b   :  { %v2281_v56 = vadd.f32 %v2397_v52, %v2280_v53 }
0x353d   :  { %2284 = vst.msk [vmem:[%s3440_s9] sm:$0x3] %vm2283_vm3, %v2281_v56 }

</bundles_post_ra>
